<compile_context>
chip_gen: v6e
topology: v6e:2x2x1
jax: 0.10.0
libtpu: 0.0.40
codegen_flags: <defaults>
</compile_context>

<pallas_src>
import math
from functools import partial

import jax
import jax.numpy as jnp
from jax.experimental import pallas as pl
from jax.experimental.pallas import tpu as pltpu


_LRELU_GAIN = math.sqrt(2.0)
_DEFAULT_VMEM_CAP = 64 << 20          # v7x has the smallest per-core VMEM (64 MiB)


# -----------------------------------------------------------------------------
# helpers (match StyleNeRF's `dividable`)
# -----------------------------------------------------------------------------
def dividable(n):
    i = int(math.sqrt(n))
    while n % i != 0:
        i -= 1
    return i, n // i


def _round_up(x, m):
    return (x + m - 1) // m * m


# -----------------------------------------------------------------------------
# batch-tile sizing (VMEM-budget driven, padded-tile aware)
# -----------------------------------------------------------------------------
def _tile_vmem_bytes(tb, P, Cin, Chid, CHP, n_blocks):
    """Rough padded-VMEM footprint of one grid step (pipelined I/O + live acts)."""
    Pp = _round_up(P, 8)
    V = 2 * n_blocks + 3
    x_t = tb * Pp * _round_up(Cin, 128) * 2                      # bf16 pre-modulated x
    vec_t = tb * _round_up(V, 8) * _round_up(Chid, 128) * 4      # packed style/demod vecs
    out_t = tb * Pp * CHP * 4                                    # fused f32 output tile
    pipelined = 2 * (x_t + vec_t + out_t)                        # Pallas double-buffers I/O
    act = 4 * tb * Pp * _round_up(2 * Chid, 128) * 4             # live intermediates (est.)
    return pipelined + act


def _resident_bytes(Cin, Chid, CHP, n_blocks):
    """VMEM held by the resident (constant-index) weights/biases."""
    w = (_round_up(Cin, 8) * _round_up(Chid, 128)
         + n_blocks * Chid * _round_up(Chid, 128)
         + _round_up(2 * Chid, 8) * CHP) * 2                     # bf16 weights
    b = (2 + n_blocks) * 8 * _round_up(Chid, 128) * 4 + 8 * CHP * 4
    return 2 * (w + b)                                           # double-buffered too


def _pick_batch_tile(B, P, Cin, Chid, CHP, n_blocks, budget_bytes):
    """Largest TB dividing B that fits the VMEM budget; prefer grid >= 2 so the
    'parallel' grid axis can shard across v7x's two TensorCores.  TB only ever
    appears as a *leading* block dim, so it carries no (8,128) constraint."""
    cands = [tb for tb in range(1, B + 1) if B % tb == 0]
    fits = [tb for tb in cands
            if _tile_vmem_bytes(tb, P, Cin, Chid, CHP, n_blocks) <= budget_bytes]
    if not fits:
        return min(cands)
    multi = [tb for tb in fits if B // tb >= 2]
    return max(multi) if multi else max(fits)


# -----------------------------------------------------------------------------
# fused Pallas kernel: fc_in -> blocks -> fused {color | density} head
# -----------------------------------------------------------------------------
def _fused_mlp_kernel(x_ref, vecs_ref, w_in_ref, b_in_ref, w_blk_ref, b_blk_ref,
                      w_heads_ref, b_heads_ref, out_ref, *, n_blocks, compute_dtype):
    """One batch tile of TB samples; the whole MLP stays in VMEM / registers.

    x_ref       : (TB, P, Cin)   bf16, already modulated by the fc_in style
    vecs_ref    : (TB, V, Chid)  f32 packed per-sample vectors:
                    [0]                = d_in   (fc_in demod coeffs)
                    [1 .. n_blocks]    = s_blk  (block styles, lrelu gain folded)
                    [n_blocks+1 .. 2n] = d_blk  (block demod coeffs)
                    [2n+1], [2n+2]     = s_col, s_den (head styles, gains folded)
    w_*_ref     : resident transposed conv weights (compute_dtype)
    b_*_ref     : resident biases (f32)
    out_ref     : (TB, P, CHP)   f32: lanes [0,Cout)=color, [Cout]=density, rest 0
    """
    TB, P, Cin = x_ref.shape
    Chid = w_in_ref.shape[1]
    CHP = w_heads_ref.shape[1]
    M = TB * P

    def vec(j):                                  # (TB, 1, Chid) per-sample vector j
        return vecs_ref[:, j:j + 1, :]

    def mm(h2d, w):                              # MXU matmul, f32 accumulation
        return jnp.dot(h2d, w, preferred_element_type=jnp.float32)

    # ---- fc_in (x already style-modulated + cast to bf16 in the wrapper)
    y = mm(x_ref[...].reshape(M, Cin), w_in_ref[...]).reshape(TB, P, Chid)
    y = y * vec(0) + b_in_ref[...]
    h = jnp.where(y >= 0.0, y, 0.2 * y)          # lrelu; sqrt(2) gain folded into styles

    # ---- hidden blocks (static unroll, weights resident in VMEM)
    for l in range(n_blocks):
        hm = (h * vec(1 + l)).astype(compute_dtype)
        y = mm(hm.reshape(M, Chid), w_blk_ref[l]).reshape(TB, P, Chid)
        y = y * vec(1 + n_blocks + l) + b_blk_ref[l]
        h = jnp.where(y >= 0.0, y, 0.2 * y)

    # ---- fused heads: [color | density | zero-pad] via one block-diag matmul
    j_col, j_den = 1 + 2 * n_blocks, 2 + 2 * n_blocks
    hm = jnp.concatenate([(h * vec(j_col)).astype(compute_dtype),
                          (h * vec(j_den)).astype(compute_dtype)], axis=-1)
    yh = mm(hm.reshape(M, 2 * Chid), w_heads_ref[...]).reshape(TB, P, CHP)
    out_ref[...] = (yh + b_heads_ref[...]).astype(out_ref.dtype)


# -----------------------------------------------------------------------------
# XLA glue: style affine + demodulation coefficients (tiny (N,C) matmuls)
# -----------------------------------------------------------------------------
def _layer_styles(layer, w_latent, K, *, demodulate, style_gain, aff_gain,
                  post_gain=1.0):
    """FullyConnectedLayer affine -> (B, Cin) styles and (B, Cout) demod coeffs.

    `post_gain` (the previous layer's lrelu gain) is applied to the style AFTER
    the demod coefficients are computed, so folding it is numerically identical
    to multiplying the previous layer's output by the gain.
    """
    s = (w_latent @ (layer["affine_w"] * aff_gain).T + layer["affine_b"]) * style_gain
    w = layer["weight"]                                      # (Cout, Cin)
    d = None
    if demodulate:
        d = jax.lax.rsqrt((s * s) @ (w * w).T + 1e-8)        # (N, Cout)
        d = jnp.repeat(d, K, axis=0)                         # (B, Cout)
    s = jnp.repeat(s * post_gain, K, axis=0)                 # 'b c -> (b s) c', s=K
    return s, d


# -----------------------------------------------------------------------------
# parameters (deterministic init, shapes as in the PyTorch module __init__)
# -----------------------------------------------------------------------------
def init_params(key, *, w_dim, input_dim, output_dim, hidden_dim, depth):
    keys = jax.random.split(key, depth + 2)

    def make_layer(k, in_c, out_c):
        k1, k2 = jax.random.split(k)
        return dict(
            affine_w=jax.random.normal(k1, (in_c, w_dim), jnp.float32),  # FC(w_dim->in_c)
            affine_b=jnp.ones((in_c,), jnp.float32),                     # bias_init = 1
            weight=jax.random.normal(k2, (out_c, in_c), jnp.float32),    # (Cout,Cin,1,1)
            bias=jnp.zeros((out_c,), jnp.float32),
        )

    return dict(
        fc_in=make_layer(keys[0], input_dim, hidden_dim),
        blocks=[make_layer(keys[i + 1], hidden_dim, hidden_dim) for i in range(depth - 1)],
        density_head=make_layer(keys[depth], hidden_dim, 1),
        color_head=make_layer(keys[depth + 1], hidden_dim, output_dim),
    )


# -----------------------------------------------------------------------------
# forward pass (glue in JAX, hot path in one fused Pallas kernel)
# -----------------------------------------------------------------------------
def stylenerf_mlp_forward(params, points, latents, cfg,
                          compute_dtype=jnp.bfloat16, batch_tile=None):
    N, R, K, Cin = points.shape
    H, W = dividable(R)
    assert H * W == R
    depth, Chid, Cout = cfg["depth"], cfg["hidden_dim"], cfg["output_dim"]
    n_blocks = depth - 1
    assert n_blocks >= 1          # TODO(synk): depth == 1 path not implemented.
    B, P = N * K, R
    Cheads = Cout + 1
    CHP = _round_up(Cheads, 128)  # lane-dense fused-head width (sliced outside)

    aff_gain = 1.0 / math.sqrt(cfg["w_dim"])
    head_gain = 1.0 / math.sqrt(Chid)            # ToRGBLayer weight_gain (k=1)

    # rearrange 'N (H W) K C -> (N K) C H W'  -> channels-last (B, P, C)
    x = jnp.transpose(points, (0, 2, 1, 3)).reshape(B, P, Cin)

    # --- fc_in: fold its modulation style directly into the (tiny) input
    s_in, d_in = _layer_styles(params["fc_in"], latents[:, 0], K,
                               demodulate=True, style_gain=1.0, aff_gain=aff_gain)
    x_mod = (x * s_in[:, None, :]).astype(compute_dtype)         # (B, P, Cin) bf16

    # --- block styles / demod (lrelu gain of the previous layer folded into s)
    s_bs, d_bs = [], []
    for idx in range(n_blocks):
        s_b, d_b = _layer_styles(params["blocks"][idx], latents[:, idx + 1], K,
                                 demodulate=True, style_gain=1.0, aff_gain=aff_gain,
                                 post_gain=_LRELU_GAIN)
        s_bs.append(s_b)
        d_bs.append(d_b)

    # --- head styles (ToRGB weight gain + last hidden layer's lrelu gain folded)
    s_den, _ = _layer_styles(params["density_head"], latents[:, depth], K,
                             demodulate=False, style_gain=head_gain,
                             aff_gain=aff_gain, post_gain=_LRELU_GAIN)
    s_col, _ = _layer_styles(params["color_head"], latents[:, -1], K,
                             demodulate=False, style_gain=head_gain,
                             aff_gain=aff_gain, post_gain=_LRELU_GAIN)

    # pack ALL per-sample vectors into one dense (B, V, Chid) array (one DMA stream)
    vecs = jnp.stack([d_in] + s_bs + d_bs + [s_col, s_den], axis=1)
    V = vecs.shape[1]

    # resident weights / biases
    w_in = params["fc_in"]["weight"].T.astype(compute_dtype)            # (Cin, Chid)
    b_in = params["fc_in"]["bias"].reshape(1, Chid)
    w_blk = jnp.stack([params["blocks"][i]["weight"].T for i in range(n_blocks)]
                      ).astype(compute_dtype)                            # (n_blocks, Chid, Chid)
    b_blk = jnp.stack([params["blocks"][i]["bias"] for i in range(n_blocks)]
                      ).reshape(n_blocks, 1, Chid)

    # fused, lane-dense head weight: cols [0,Cout)=color, [Cout]=density, rest 0
    w_heads = jnp.zeros((2 * Chid, CHP), jnp.float32)
    w_heads = w_heads.at[:Chid, :Cout].set(params["color_head"]["weight"].T)
    w_heads = w_heads.at[Chid:, Cout].set(params["density_head"]["weight"][0])
    w_heads = w_heads.astype(compute_dtype)
    b_heads = jnp.zeros((1, CHP), jnp.float32)
    b_heads = b_heads.at[0, :Cout].set(params["color_head"]["bias"])
    b_heads = b_heads.at[0, Cout].set(params["density_head"]["bias"][0])

    # --- explicit VMEM limit + conservative tile budget (safe for v7x's 64 MiB)
    try:
        vmem_cap = int(getattr(pltpu.get_tpu_info(), "vmem_capacity_bytes",
                               _DEFAULT_VMEM_CAP))
    except Exception:
        vmem_cap = _DEFAULT_VMEM_CAP
    vmem_limit_bytes = int(min(vmem_cap * 7 // 8, 112 << 20))
    budget = max(1 << 20,
                 min(vmem_limit_bytes // 2, 28 << 20)
                 - _resident_bytes(Cin, Chid, CHP, n_blocks))

    if batch_tile is None:
        TB = _pick_batch_tile(B, P, Cin, Chid, CHP, n_blocks, budget)
    else:
        assert B % batch_tile == 0
        TB = batch_tile
    grid = (B // TB,)

    kern = partial(_fused_mlp_kernel, n_blocks=n_blocks, compute_dtype=compute_dtype)

    fused = pl.pallas_call(
        kern,
        out_shape=jax.ShapeDtypeStruct((B, P, CHP), jnp.float32),
        grid=grid,
        in_specs=[
            pl.BlockSpec((TB, P, Cin), lambda i: (i, 0, 0)),             # x (pre-modulated)
            pl.BlockSpec((TB, V, Chid), lambda i: (i, 0, 0)),            # packed style/demod
            pl.BlockSpec((Cin, Chid), lambda i: (0, 0)),                 # w_in   (resident)
            pl.BlockSpec((1, Chid), lambda i: (0, 0)),                   # b_in   (resident)
            pl.BlockSpec((n_blocks, Chid, Chid), lambda i: (0, 0, 0)),   # w_blk  (resident)
            pl.BlockSpec((n_blocks, 1, Chid), lambda i: (0, 0, 0)),      # b_blk  (resident)
            pl.BlockSpec((2 * Chid, CHP), lambda i: (0, 0)),             # w_heads(resident)
            pl.BlockSpec((1, CHP), lambda i: (0, 0)),                    # b_heads(resident)
        ],
        out_specs=pl.BlockSpec((TB, P, CHP), lambda i: (i, 0, 0)),
        compiler_params=pltpu.CompilerParams(
            dimension_semantics=("parallel",),
            vmem_limit_bytes=vmem_limit_bytes),
    )(x_mod, vecs, w_in, b_in, w_blk, b_blk, w_heads, b_heads)

    color = fused[..., :Cout]
    density = fused[..., Cout:Cout + 1]

    # rearrange '(N K) C H W -> N (H W K) C'
    def to_out(y):
        Cy = y.shape[-1]
        return jnp.transpose(y.reshape(N, K, P, Cy), (0, 2, 1, 3)).reshape(N, P * K, Cy)

    return {"density": to_out(density), "color": to_out(color)}


# -----------------------------------------------------------------------------
# pure-JAX reference (independent re-implementation for correctness checks)
# -----------------------------------------------------------------------------
def reference_forward(params, points, latents, cfg, compute_dtype=jnp.float32):
    N, R, K, Cin = points.shape
    B, P = N * K, R
    x = jnp.transpose(points, (0, 2, 1, 3)).reshape(B, P, Cin)
    aff_gain = 1.0 / math.sqrt(cfg["w_dim"])
    head_gain = 1.0 / math.sqrt(cfg["hidden_dim"])

    def layer(p, xin, z, demodulate, lrelu, style_gain=1.0):
        s = (z @ (p["affine_w"] * aff_gain).T + p["affine_b"]) * style_gain
        s = jnp.repeat(s, K, axis=0)                              # (B, Cin)
        w = p["weight"]                                           # (Cout, Cin)
        hm = (xin * s[:, None, :]).astype(compute_dtype)
        y = jnp.einsum("bpi,oi->bpo", hm, w.astype(compute_dtype),
                       preferred_element_type=jnp.float32)
        if demodulate:
            d = jax.lax.rsqrt(jnp.einsum("bi,oi->bo", s * s, w * w) + 1e-8)
            y = y * d[:, None, :]
        y = y + p["bias"][None, None, :]
        if lrelu:
            y = jnp.where(y >= 0, y, 0.2 * y) * _LRELU_GAIN
        return y

    out = layer(params["fc_in"], x, latents[:, 0], True, True)
    for idx in range(cfg["depth"] - 1):
        out = layer(params["blocks"][idx], out, latents[:, idx + 1], True, True)
    density = layer(params["density_head"], out, latents[:, cfg["depth"]],
                    False, False, head_gain)
    color = layer(params["color_head"], out, latents[:, -1], False, False, head_gain)

    def to_out(y):
        Cy = y.shape[-1]
        return jnp.transpose(y.reshape(N, K, P, Cy), (0, 2, 1, 3)).reshape(N, P * K, Cy)

    return {"density": to_out(density), "color": to_out(color)}


# -----------------------------------------------------------------------------
if __name__ == "__main__":
    cfg = dict(w_dim=32, input_dim=3, output_dim=16, hidden_dim=32, depth=4)
    N, R, K = 4, 16, 4               # points: (N, R, K, 3); dividable(16) = (4, 4)
    num_ws = cfg["depth"] + 2        # one w per Style2Layer + density head + color head

    key = jax.random.PRNGKey(0)
    kp, kx, kw = jax.random.split(key, 3)
    params = init_params(kp, **cfg)
    points = jax.random.normal(kx, (N, R, K, cfg["input_dim"]), jnp.float32)
    latents = jax.random.normal(kw, (N, num_ws, cfg["w_dim"]), jnp.float32)

    # auto-tiled path (TB chosen from the VMEM budget; grid >= 2 when possible)
    fwd = jax.jit(partial(stylenerf_mlp_forward, cfg=cfg))
    out = fwd(params, points, latents)
    jax.block_until_ready(out)

    # forced whole-batch tile (grid = 1) to exercise the TB == B path
    fwd_one = jax.jit(partial(stylenerf_mlp_forward, cfg=cfg, batch_tile=N * K))
    out_one = fwd_one(params, points, latents)
    jax.block_until_ready(out_one)

    ref_bf16 = jax.jit(partial(reference_forward, cfg=cfg,
                               compute_dtype=jnp.bfloat16))(params, points, latents)
    ref_f32 = jax.jit(partial(reference_forward, cfg=cfg,
                              compute_dtype=jnp.float32))(params, points, latents)
    jax.block_until_ready((ref_bf16, ref_f32))

    assert out["density"].shape == (N, R * K, 1)
    assert out["color"].shape == (N, R * K, cfg["output_dim"])
    # both kernel variants compute the identical tile-local math
    assert jnp.allclose(out["density"], out_one["density"], atol=1e-5, rtol=1e-5)
    assert jnp.allclose(out["color"], out_one["color"], atol=1e-5, rtol=1e-5)
    for o in (out, out_one):
        # matched-precision check vs. a bf16-operand reference
        assert jnp.allclose(o["density"], ref_bf16["density"], atol=1e-2, rtol=1e-2)
        assert jnp.allclose(o["color"], ref_bf16["color"], atol=1e-2, rtol=1e-2)
        # semantic check vs. the full-f32 reference (bf16 operand rounding only)
        assert jnp.allclose(o["density"], ref_f32["density"], atol=5e-2, rtol=5e-2)
        assert jnp.allclose(o["color"], ref_f32["color"], atol=5e-2, rtol=5e-2)

    print("KERNEL_OK")
</pallas_src>

<mosaic_0001>
module attributes {stable_mosaic.version = 11 : i64} {
  func.func @_fused_mlp_kernel(%arg0: i32, %arg1: memref<8x16x3xbf16, #tpu.memory_space<vmem>>, %arg2: memref<8x9x32xf32, #tpu.memory_space<vmem>>, %arg3: memref<3x32xbf16, #tpu.memory_space<vmem>>, %arg4: memref<1x32xf32, #tpu.memory_space<vmem>>, %arg5: memref<3x32x32xbf16, #tpu.memory_space<vmem>>, %arg6: memref<3x1x32xf32, #tpu.memory_space<vmem>>, %arg7: memref<64x128xbf16, #tpu.memory_space<vmem>>, %arg8: memref<1x128xf32, #tpu.memory_space<vmem>>, %arg9: memref<8x16x128xf32, #tpu.memory_space<vmem>>) attributes {dimension_semantics = [#tpu.dimension_semantics<parallel>], iteration_bounds = array<i64: 2>, scalar_prefetch = 0 : i64, scratch_operands = 0 : i64, tpu.core_type = #tpu.core_type<tc>, window_params = [{transform_indices = @transform_0, window_bounds = array<i64: 8, 16, 3>}, {transform_indices = @transform_1, window_bounds = array<i64: 8, 9, 32>}, {pipeline_mode = #tpu.pipeline_mode<synchronous>, transform_indices = @transform_2, window_bounds = array<i64: 3, 32>}, {pipeline_mode = #tpu.pipeline_mode<synchronous>, transform_indices = @transform_3, window_bounds = array<i64: 1, 32>}, {pipeline_mode = #tpu.pipeline_mode<synchronous>, transform_indices = @transform_4, window_bounds = array<i64: 3, 32, 32>}, {pipeline_mode = #tpu.pipeline_mode<synchronous>, transform_indices = @transform_5, window_bounds = array<i64: 3, 1, 32>}, {pipeline_mode = #tpu.pipeline_mode<synchronous>, transform_indices = @transform_6, window_bounds = array<i64: 64, 128>}, {pipeline_mode = #tpu.pipeline_mode<synchronous>, transform_indices = @transform_7, window_bounds = array<i64: 1, 128>}, {transform_indices = @transform_8, window_bounds = array<i64: 8, 16, 128>}]} {
    %c0 = arith.constant 0 : index
    %c0_0 = arith.constant 0 : index
    %c0_1 = arith.constant 0 : index
    %0 = vector.load %arg1[%c0, %c0_0, %c0_1] : memref<8x16x3xbf16, #tpu.memory_space<vmem>>, vector<8x16x3xbf16>
    %1 = vector.shape_cast %0 : vector<8x16x3xbf16> to vector<128x3xbf16>
    %c0_2 = arith.constant 0 : index
    %c0_3 = arith.constant 0 : index
    %2 = vector.load %arg3[%c0_2, %c0_3] : memref<3x32xbf16, #tpu.memory_space<vmem>>, vector<3x32xbf16>
    %cst = arith.constant dense<0.000000e+00> : vector<128x32xf32>
    %3 = tpu.matmul %1, %2, %cst {dimension_numbers = #tpu.dot_dimension_numbers<[1], [0], [0], [1], [0, 0, 1, 1], [], []>} : vector<128x3xbf16>, vector<3x32xbf16>, vector<128x32xf32> -> vector<128x32xf32>
    %4 = vector.shape_cast %3 : vector<128x32xf32> to vector<8x16x32xf32>
    %c0_4 = arith.constant 0 : index
    %c0_5 = arith.constant 0 : index
    %c0_6 = arith.constant 0 : index
    %5 = vector.load %arg2[%c0_4, %c0_5, %c0_6] : memref<8x9x32xf32, #tpu.memory_space<vmem>>, vector<8x1x32xf32>
    %6 = vector.broadcast %5 : vector<8x1x32xf32> to vector<8x16x32xf32>
    %7 = arith.mulf %4, %6 : vector<8x16x32xf32>
    %c0_7 = arith.constant 0 : index
    %c0_8 = arith.constant 0 : index
    %8 = vector.load %arg4[%c0_7, %c0_8] : memref<1x32xf32, #tpu.memory_space<vmem>>, vector<1x32xf32>
    %9 = vector.shape_cast %8 : vector<1x32xf32> to vector<1x1x32xf32>
    %10 = vector.broadcast %9 : vector<1x1x32xf32> to vector<8x16x32xf32>
    %11 = arith.addf %7, %10 : vector<8x16x32xf32>
    %cst_9 = arith.constant 0.000000e+00 : f32
    %12 = vector.broadcast %cst_9 : f32 to vector<8x16x32xf32>
    %13 = arith.cmpf oge, %11, %12 : vector<8x16x32xf32>
    %cst_10 = arith.constant 2.000000e-01 : f32
    %14 = vector.broadcast %cst_10 : f32 to vector<8x16x32xf32>
    %15 = arith.mulf %14, %11 : vector<8x16x32xf32>
    %16 = arith.select %13, %11, %15 : vector<8x16x32xi1>, vector<8x16x32xf32>
    %c0_11 = arith.constant 0 : index
    %c1 = arith.constant 1 : index
    %c0_12 = arith.constant 0 : index
    %17 = vector.load %arg2[%c0_11, %c1, %c0_12] : memref<8x9x32xf32, #tpu.memory_space<vmem>>, vector<8x1x32xf32>
    %18 = vector.broadcast %17 : vector<8x1x32xf32> to vector<8x16x32xf32>
    %19 = arith.mulf %16, %18 : vector<8x16x32xf32>
    %20 = arith.truncf %19 : vector<8x16x32xf32> to vector<8x16x32xbf16>
    %21 = vector.shape_cast %20 : vector<8x16x32xbf16> to vector<128x32xbf16>
    %c0_13 = arith.constant 0 : index
    %c0_14 = arith.constant 0 : index
    %c0_15 = arith.constant 0 : index
    %22 = vector.load %arg5[%c0_13, %c0_14, %c0_15] : memref<3x32x32xbf16, #tpu.memory_space<vmem>>, vector<1x32x32xbf16>
    %23 = vector.shape_cast %22 : vector<1x32x32xbf16> to vector<32x32xbf16>
    %cst_16 = arith.constant dense<0.000000e+00> : vector<128x32xf32>
    %24 = tpu.matmul %21, %23, %cst_16 {dimension_numbers = #tpu.dot_dimension_numbers<[1], [0], [0], [1], [0, 0, 1, 1], [], []>} : vector<128x32xbf16>, vector<32x32xbf16>, vector<128x32xf32> -> vector<128x32xf32>
    %25 = vector.shape_cast %24 : vector<128x32xf32> to vector<8x16x32xf32>
    %c0_17 = arith.constant 0 : index
    %c4 = arith.constant 4 : index
    %c0_18 = arith.constant 0 : index
    %26 = vector.load %arg2[%c0_17, %c4, %c0_18] : memref<8x9x32xf32, #tpu.memory_space<vmem>>, vector<8x1x32xf32>
    %27 = vector.broadcast %26 : vector<8x1x32xf32> to vector<8x16x32xf32>
    %28 = arith.mulf %25, %27 : vector<8x16x32xf32>
    %c0_19 = arith.constant 0 : index
    %c0_20 = arith.constant 0 : index
    %c0_21 = arith.constant 0 : index
    %29 = vector.load %arg6[%c0_19, %c0_20, %c0_21] : memref<3x1x32xf32, #tpu.memory_space<vmem>>, vector<1x1x32xf32>
    %30 = vector.shape_cast %29 : vector<1x1x32xf32> to vector<1x32xf32>
    %31 = vector.shape_cast %30 : vector<1x32xf32> to vector<1x1x32xf32>
    %32 = vector.broadcast %31 : vector<1x1x32xf32> to vector<8x16x32xf32>
    %33 = arith.addf %28, %32 : vector<8x16x32xf32>
    %cst_22 = arith.constant 0.000000e+00 : f32
    %34 = vector.broadcast %cst_22 : f32 to vector<8x16x32xf32>
    %35 = arith.cmpf oge, %33, %34 : vector<8x16x32xf32>
    %cst_23 = arith.constant 2.000000e-01 : f32
    %36 = vector.broadcast %cst_23 : f32 to vector<8x16x32xf32>
    %37 = arith.mulf %36, %33 : vector<8x16x32xf32>
    %38 = arith.select %35, %33, %37 : vector<8x16x32xi1>, vector<8x16x32xf32>
    %c0_24 = arith.constant 0 : index
    %c2 = arith.constant 2 : index
    %c0_25 = arith.constant 0 : index
    %39 = vector.load %arg2[%c0_24, %c2, %c0_25] : memref<8x9x32xf32, #tpu.memory_space<vmem>>, vector<8x1x32xf32>
    %40 = vector.broadcast %39 : vector<8x1x32xf32> to vector<8x16x32xf32>
    %41 = arith.mulf %38, %40 : vector<8x16x32xf32>
    %42 = arith.truncf %41 : vector<8x16x32xf32> to vector<8x16x32xbf16>
    %43 = vector.shape_cast %42 : vector<8x16x32xbf16> to vector<128x32xbf16>
    %c1_26 = arith.constant 1 : index
    %c0_27 = arith.constant 0 : index
    %c0_28 = arith.constant 0 : index
    %44 = vector.load %arg5[%c1_26, %c0_27, %c0_28] : memref<3x32x32xbf16, #tpu.memory_space<vmem>>, vector<1x32x32xbf16>
    %45 = vector.shape_cast %44 : vector<1x32x32xbf16> to vector<32x32xbf16>
    %cst_29 = arith.constant dense<0.000000e+00> : vector<128x32xf32>
    %46 = tpu.matmul %43, %45, %cst_29 {dimension_numbers = #tpu.dot_dimension_numbers<[1], [0], [0], [1], [0, 0, 1, 1], [], []>} : vector<128x32xbf16>, vector<32x32xbf16>, vector<128x32xf32> -> vector<128x32xf32>
    %47 = vector.shape_cast %46 : vector<128x32xf32> to vector<8x16x32xf32>
    %c0_30 = arith.constant 0 : index
    %c5 = arith.constant 5 : index
    %c0_31 = arith.constant 0 : index
    %48 = vector.load %arg2[%c0_30, %c5, %c0_31] : memref<8x9x32xf32, #tpu.memory_space<vmem>>, vector<8x1x32xf32>
    %49 = vector.broadcast %48 : vector<8x1x32xf32> to vector<8x16x32xf32>
    %50 = arith.mulf %47, %49 : vector<8x16x32xf32>
    %c1_32 = arith.constant 1 : index
    %c0_33 = arith.constant 0 : index
    %c0_34 = arith.constant 0 : index
    %51 = vector.load %arg6[%c1_32, %c0_33, %c0_34] : memref<3x1x32xf32, #tpu.memory_space<vmem>>, vector<1x1x32xf32>
    %52 = vector.shape_cast %51 : vector<1x1x32xf32> to vector<1x32xf32>
    %53 = vector.shape_cast %52 : vector<1x32xf32> to vector<1x1x32xf32>
    %54 = vector.broadcast %53 : vector<1x1x32xf32> to vector<8x16x32xf32>
    %55 = arith.addf %50, %54 : vector<8x16x32xf32>
    %cst_35 = arith.constant 0.000000e+00 : f32
    %56 = vector.broadcast %cst_35 : f32 to vector<8x16x32xf32>
    %57 = arith.cmpf oge, %55, %56 : vector<8x16x32xf32>
    %cst_36 = arith.constant 2.000000e-01 : f32
    %58 = vector.broadcast %cst_36 : f32 to vector<8x16x32xf32>
    %59 = arith.mulf %58, %55 : vector<8x16x32xf32>
    %60 = arith.select %57, %55, %59 : vector<8x16x32xi1>, vector<8x16x32xf32>
    %c0_37 = arith.constant 0 : index
    %c3 = arith.constant 3 : index
    %c0_38 = arith.constant 0 : index
    %61 = vector.load %arg2[%c0_37, %c3, %c0_38] : memref<8x9x32xf32, #tpu.memory_space<vmem>>, vector<8x1x32xf32>
    %62 = vector.broadcast %61 : vector<8x1x32xf32> to vector<8x16x32xf32>
    %63 = arith.mulf %60, %62 : vector<8x16x32xf32>
    %64 = arith.truncf %63 : vector<8x16x32xf32> to vector<8x16x32xbf16>
    %65 = vector.shape_cast %64 : vector<8x16x32xbf16> to vector<128x32xbf16>
    %c2_39 = arith.constant 2 : index
    %c0_40 = arith.constant 0 : index
    %c0_41 = arith.constant 0 : index
    %66 = vector.load %arg5[%c2_39, %c0_40, %c0_41] : memref<3x32x32xbf16, #tpu.memory_space<vmem>>, vector<1x32x32xbf16>
    %67 = vector.shape_cast %66 : vector<1x32x32xbf16> to vector<32x32xbf16>
    %cst_42 = arith.constant dense<0.000000e+00> : vector<128x32xf32>
    %68 = tpu.matmul %65, %67, %cst_42 {dimension_numbers = #tpu.dot_dimension_numbers<[1], [0], [0], [1], [0, 0, 1, 1], [], []>} : vector<128x32xbf16>, vector<32x32xbf16>, vector<128x32xf32> -> vector<128x32xf32>
    %69 = vector.shape_cast %68 : vector<128x32xf32> to vector<8x16x32xf32>
    %c0_43 = arith.constant 0 : index
    %c6 = arith.constant 6 : index
    %c0_44 = arith.constant 0 : index
    %70 = vector.load %arg2[%c0_43, %c6, %c0_44] : memref<8x9x32xf32, #tpu.memory_space<vmem>>, vector<8x1x32xf32>
    %71 = vector.broadcast %70 : vector<8x1x32xf32> to vector<8x16x32xf32>
    %72 = arith.mulf %69, %71 : vector<8x16x32xf32>
    %c2_45 = arith.constant 2 : index
    %c0_46 = arith.constant 0 : index
    %c0_47 = arith.constant 0 : index
    %73 = vector.load %arg6[%c2_45, %c0_46, %c0_47] : memref<3x1x32xf32, #tpu.memory_space<vmem>>, vector<1x1x32xf32>
    %74 = vector.shape_cast %73 : vector<1x1x32xf32> to vector<1x32xf32>
    %75 = vector.shape_cast %74 : vector<1x32xf32> to vector<1x1x32xf32>
    %76 = vector.broadcast %75 : vector<1x1x32xf32> to vector<8x16x32xf32>
    %77 = arith.addf %72, %76 : vector<8x16x32xf32>
    %cst_48 = arith.constant 0.000000e+00 : f32
    %78 = vector.broadcast %cst_48 : f32 to vector<8x16x32xf32>
    %79 = arith.cmpf oge, %77, %78 : vector<8x16x32xf32>
    %cst_49 = arith.constant 2.000000e-01 : f32
    %80 = vector.broadcast %cst_49 : f32 to vector<8x16x32xf32>
    %81 = arith.mulf %80, %77 : vector<8x16x32xf32>
    %82 = arith.select %79, %77, %81 : vector<8x16x32xi1>, vector<8x16x32xf32>
    %c0_50 = arith.constant 0 : index
    %c7 = arith.constant 7 : index
    %c0_51 = arith.constant 0 : index
    %83 = vector.load %arg2[%c0_50, %c7, %c0_51] : memref<8x9x32xf32, #tpu.memory_space<vmem>>, vector<8x1x32xf32>
    %84 = vector.broadcast %83 : vector<8x1x32xf32> to vector<8x16x32xf32>
    %85 = arith.mulf %82, %84 : vector<8x16x32xf32>
    %86 = arith.truncf %85 : vector<8x16x32xf32> to vector<8x16x32xbf16>
    %c0_52 = arith.constant 0 : index
    %c8 = arith.constant 8 : index
    %c0_53 = arith.constant 0 : index
    %87 = vector.load %arg2[%c0_52, %c8, %c0_53] : memref<8x9x32xf32, #tpu.memory_space<vmem>>, vector<8x1x32xf32>
    %88 = vector.broadcast %87 : vector<8x1x32xf32> to vector<8x16x32xf32>
    %89 = arith.mulf %82, %88 : vector<8x16x32xf32>
    %90 = arith.truncf %89 : vector<8x16x32xf32> to vector<8x16x32xbf16>
    %91 = tpu.concatenate %86, %90 in 2 : vector<8x16x32xbf16>, vector<8x16x32xbf16> -> vector<8x16x64xbf16>
    %92 = vector.shape_cast %91 : vector<8x16x64xbf16> to vector<128x64xbf16>
    %c0_54 = arith.constant 0 : index
    %c0_55 = arith.constant 0 : index
    %93 = vector.load %arg7[%c0_54, %c0_55] : memref<64x128xbf16, #tpu.memory_space<vmem>>, vector<64x128xbf16>
    %cst_56 = arith.constant dense<0.000000e+00> : vector<128x128xf32>
    %94 = tpu.matmul %92, %93, %cst_56 {dimension_numbers = #tpu.dot_dimension_numbers<[1], [0], [0], [1], [0, 0, 1, 1], [], []>} : vector<128x64xbf16>, vector<64x128xbf16>, vector<128x128xf32> -> vector<128x128xf32>
    %95 = vector.shape_cast %94 : vector<128x128xf32> to vector<8x16x128xf32>
    %c0_57 = arith.constant 0 : index
    %c0_58 = arith.constant 0 : index
    %96 = vector.load %arg8[%c0_57, %c0_58] : memref<1x128xf32, #tpu.memory_space<vmem>>, vector<1x128xf32>
    %97 = vector.shape_cast %96 : vector<1x128xf32> to vector<1x1x128xf32>
    %98 = vector.broadcast %97 : vector<1x1x128xf32> to vector<8x16x128xf32>
    %99 = arith.addf %95, %98 : vector<8x16x128xf32>
    %c0_59 = arith.constant 0 : index
    %c0_60 = arith.constant 0 : index
    %c0_61 = arith.constant 0 : index
    %100 = vector.load %arg9[%c0_59, %c0_60, %c0_61] : memref<8x16x128xf32, #tpu.memory_space<vmem>>, vector<8x16x128xf32>
    tpu.vector_store %arg9[%c0_59, %c0_60, %c0_61], %99 {strides = array<i32>} : memref<8x16x128xf32, #tpu.memory_space<vmem>>, vector<8x16x128xf32>,
    return
  }
  func.func @transform_0(%arg0: i32) -> (i32, i32, i32) {
    %c0_i32 = arith.constant 0 : i32
    %c0_i32_0 = arith.constant 0 : i32
    %c0_i32_1 = arith.constant 0 : i32
    return %arg0, %c0_i32, %c0_i32_0 : i32, i32, i32
  }
  func.func @transform_1(%arg0: i32) -> (i32, i32, i32) {
    %c0_i32 = arith.constant 0 : i32
    %c0_i32_0 = arith.constant 0 : i32
    %c0_i32_1 = arith.constant 0 : i32
    return %arg0, %c0_i32, %c0_i32_0 : i32, i32, i32
  }
  func.func @transform_2(%arg0: i32) -> (i32, i32) {
    %c0_i32 = arith.constant 0 : i32
    %c0_i32_0 = arith.constant 0 : i32
    %c0_i32_1 = arith.constant 0 : i32
    return %c0_i32, %c0_i32_0 : i32, i32
  }
  func.func @transform_3(%arg0: i32) -> (i32, i32) {
    %c0_i32 = arith.constant 0 : i32
    %c0_i32_0 = arith.constant 0 : i32
    %c0_i32_1 = arith.constant 0 : i32
    return %c0_i32, %c0_i32_0 : i32, i32
  }
  func.func @transform_4(%arg0: i32) -> (i32, i32, i32) {
    %c0_i32 = arith.constant 0 : i32
    %c0_i32_0 = arith.constant 0 : i32
    %c0_i32_1 = arith.constant 0 : i32
    %c0_i32_2 = arith.constant 0 : i32
    return %c0_i32, %c0_i32_0, %c0_i32_1 : i32, i32, i32
  }
  func.func @transform_5(%arg0: i32) -> (i32, i32, i32) {
    %c0_i32 = arith.constant 0 : i32
    %c0_i32_0 = arith.constant 0 : i32
    %c0_i32_1 = arith.constant 0 : i32
    %c0_i32_2 = arith.constant 0 : i32
    return %c0_i32, %c0_i32_0, %c0_i32_1 : i32, i32, i32
  }
  func.func @transform_6(%arg0: i32) -> (i32, i32) {
    %c0_i32 = arith.constant 0 : i32
    %c0_i32_0 = arith.constant 0 : i32
    %c0_i32_1 = arith.constant 0 : i32
    return %c0_i32, %c0_i32_0 : i32, i32
  }
  func.func @transform_7(%arg0: i32) -> (i32, i32) {
    %c0_i32 = arith.constant 0 : i32
    %c0_i32_0 = arith.constant 0 : i32
    %c0_i32_1 = arith.constant 0 : i32
    return %c0_i32, %c0_i32_0 : i32, i32
  }
  func.func @transform_8(%arg0: i32) -> (i32, i32, i32) {
    %c0_i32 = arith.constant 0 : i32
    %c0_i32_0 = arith.constant 0 : i32
    %c0_i32_1 = arith.constant 0 : i32
    return %arg0, %c0_i32, %c0_i32_0 : i32, i32, i32
  }
}

</mosaic_0001>

<bundles_post_ra>
// kernel: stylenerf_mlp_forward.1
= control target key start
LH: loop header
LB: loop body
LE: loop exit
PB: predicated region body
PF: predicated region fallthrough
CT: control target
= control target key end

     0   :  { %s2475_s27 = smov 0   ;;  %s2819_s0 = inlined_call_operand.vmem [shape: bf16[16,16,3], index: 0, kind: input, shape index: {}]   ;;  %s2820_s1 = inlined_call_operand.vmem [shape: f32[16,9,32], index: 1, kind: input, shape index: {}]   ;;  %s2821_s2 = inlined_call_operand.vmem [shape: bf16[3,32], index: 2, kind: input, shape index: {}]   ;;  %s2822_s3 = inlined_call_operand.vmem [shape: f32[1,32], index: 3, kind: input, shape index: {}]   ;;  %s2823_s4 = inlined_call_operand.vmem [shape: bf16[3,32,32], index: 4, kind: input, shape index: {}]   ;;  %s2824_s5 = inlined_call_operand.vmem [shape: f32[3,1,32], index: 5, kind: input, shape index: {}]   ;;  %s2825_s6 = inlined_call_operand.vmem [shape: bf16[64,128], index: 6, kind: input, shape index: {}]   ;;  %s2826_s7 = inlined_call_operand.vmem [shape: f32[1,128], index: 7, kind: input, shape index: {}]   ;;  %s2827_s8 = inlined_call_operand.vmem [shape: f32[16,16,128], index: 8, kind: output, shape index: {}]  }
   0x1 LB: > { %s2073_s28 = sadd.s32 4294967295, %s2426_s27   ;;  %p2077_p0 = scmp.ge.s32.totalorder %s2426_s27, 1  ;;  %s2426_s27 = sphi %s2475_s27, %s18_s27  }
   0x2   : > { %p276_p1 = scmp.lt.s32.totalorder %s2426_s27, 3 }
   0x4   : > { %p277_p2 = pnand %p2077_p0, %p276_p1 }
   0x5   : > { %s2078_s9 = sshll.u32 (!%p277_p2), %s2073_s28, 3  ;;  %s2429_s29 = smov (!%p277_p2), 32  }
   0x6   : > { %280 = sbr.rel (%p277_p2) target bundleno = 1211 (0x4bb), region = 52  ;;  %p319_p3 = scmp.lt.s32.totalorder (!%p277_p2), %s2078_s9, 15 }
   0xb   : > { %v356_v0 = vld [vmem:[%s2821_s2] sm:$0x3]  ;;  %vm422_vm0 = vcmask 1040384   ;;  %vm423_vm1 = vcmask 1041408   ;;  %v2428_v1 = vmov 65535   ;;  %s2829_s9 = smov (!%p319_p3, %s2078_s9), 15 }
   0xc   : > { %v424_v2 = vsel %vm422_vm0, 4294967295, %v2428_v1  ;;  %s2234_s10 = sshll.u32 %s2829_s9, 3  ;;  %vm397_vm2 = vcmask 23552   ;;  %v2410_v13 = vld [vmem:[%s2823_s4 + $0x8] sm:$0xff]   ;;  %v2411_v14 = vld [vmem:[%s2823_s4] sm:$0xff]   ;;  %s2235_s18 = sshll.u32 %s2829_s9, 4 }
   0xd   : > { %v425_v3 = vsel %vm423_vm1, %v424_v2, 0  ;;  %s323_s13 = scalar_lea.vmem %s2819_s0, %s2234_s10  ;;  %s2512_s21 = scalar_lea.vmem %s2820_s1, %s2235_s18  ;;  %v2518_v17 = vld [vmem:[%s2822_s3] ss:$0 sm:$0xff]  ;;  %vm733_vm7 = vcmask 261120  }
   0xe   : > { %v427_v4 = vand.u32 %v425_v3, %v356_v0  ;;  %v2402_v5 = vld [vmem:[%s323_s13] sm:$0xff]   ;;  %v2403_v6 = vld [vmem:[%s323_s13 + $0x8] sm:$0xff]   ;;  %v2404_v7 = vld [vmem:[%s323_s13 + $0x10] sm:$0xff]   ;;  %s2798_s12 = scalar_lea.vmem %s2827_s8, %s2235_s18 }
   0xf   : > { %2290 = vmatprep.mubr.msk.bf16.mxu0 %vm397_vm2, %v2402_v5  ;;  %v2406_v8 = vld [vmem:[%s323_s13 + $0x20] sm:$0xff]   ;;  %v2407_v9 = vld [vmem:[%s323_s13 + $0x28] sm:$0xff]   ;;  %v2408_v10 = vld [vmem:[%s323_s13 + $0x30] sm:$0xff]  }
  0x10   : > { %2288 = vmatprep.subr.bf16.mxu0 %v427_v4  ;;  %2390 = vmatprep.subr.bf16.mxu1 %v427_v4  ;;  %v2405_v11 = vld [vmem:[%s323_s13 + $0x18] sm:$0xff]   ;;  %v2104_v15 = vld [vmem:[%s2512_s21 + $0x10] ss:$0 sm:$0xff]  ;;  %v2103_v18 = vld [vmem:[%s2512_s21] ss:$0 sm:$0xff] }
  0x11   : > { %2289 = vmatpush3.bf16.msra.mxu0 %v427_v4  ;;  %2391 = vmatpush3.bf16.msra.mxu1 %v427_v4  ;;  %v2409_v12 = vld [vmem:[%s323_s13 + $0x38] sm:$0xff]   ;;  %v2107_v27 = vld [vmem:[%s2512_s21 + $0x40] ss:$0 sm:$0xff]  ;;  %v2106_v32 = vld [vmem:[%s2512_s21 + $0x30] ss:$0 sm:$0xff] }
  0x12   : > { %2298 = vmatprep.mubr.msk.bf16.mxu1 %vm397_vm2, %v2406_v8  ;;  %2306 = vmatprep.subr.bf16.mxu1 %v2410_v13  ;;  %v2105_v36 = vld [vmem:[%s2512_s21 + $0x20] ss:$0 sm:$0xff]  ;;  %v2108_v37 = vld [vmem:[%s2512_s21 + $0x50] ss:$0 sm:$0xff]  ;;  %v2113_v42 = vld [vmem:[%s2512_s21 + $0x11] ss:$0 sm:$0xff] }
  0x13   : > { %v2112_v51 = vld [vmem:[%s2512_s21 + $0x1] ss:$0 sm:$0xff] }
  0x14   : > { %2291 = vmatmul.mubr.msk.bf16.vlgmr.msra.gmra.mxu0 %vm397_vm2, %v2403_v6  ;;  %2299 = vmatmul.mubr.msk.bf16.vlgmr.msra.gmra.mxu1 %vm397_vm2, %v2407_v9 }
  0x15   : > { %2294 = vmatprep.mubr.msk.bf16.mxu0 %vm397_vm2, %v2404_v7  ;;  %2302 = vmatprep.mubr.msk.bf16.mxu1 %vm397_vm2, %v2408_v10 }
  0x16   : > { %2307 = vmatpush3.bf16.msra.mxu1 %v2410_v13 }
  0x17   : > { %2308 = vmatprep.subr.bf16.mxu1 %v2411_v14 }
  0x1a   : > { %2309 = vmatpush3.bf16.msra.mxu1 %v2411_v14 }
  0x1c   : > { %2295 = vmatmul.mubr.msk.bf16.gmra.mxu0 %vm397_vm2, %v2405_v11  ;;  %2303 = vmatmul.mubr.msk.bf16.gmra.mxu1 %vm397_vm2, %v2409_v12  ;;  %v2109_v11 = vld [vmem:[%s2512_s21 + $0x60] ss:$0 sm:$0xff] }
  0xd4   : > { %v2292_v16 = vpop.f32.mrf.mxu0  ;;  %v2300_v24 = vpop.f32.mrf.mxu1 }
  0xd5   : > { %v568_v19 = vmul.f32 %v2292_v16, %v2104_v15  ;;  %v576_v49 = vmul.f32 %v2300_v24, %v2108_v37  ;;  %v2114_v16 = vld [vmem:[%s2512_s21 + $0x21] ss:$0 sm:$0xff] }
  0xd6   : > { %v463_v20 = vpop.f32.mrf.mxu0  ;;  %v495_v30 = vpop.f32.mrf.mxu1 }
  0xd7   : > { %v591_v21 = vadd.f32 %v2518_v17, %v568_v19  ;;  %v566_v22 = vmul.f32 %v2103_v18, %v463_v20  ;;  %v574_v38 = vmul.f32 %v2107_v27, %v495_v30  ;;  %v599_v3 = vadd.f32 %v2518_v17, %v576_v49 }
  0xd8   : > { %v2293_v23 = vpop.f32.mrf.mxu0  ;;  %v2301_v39 = vpop.f32.mrf.mxu1 }
  0xd9   : > { %v589_v25 = vadd.f32 %v2518_v17, %v566_v22  ;;  %v569_v26 = vmul.f32 %v2293_v23, %v2104_v15  ;;  %v623_v28 = vmul.f32 0.2, %v591_v21  ;;  %vm607_vm3 = vcmp.ge.f32.partialorder %v591_v21, 0.0  ;;  %v2116_v22 = vld [vmem:[%s2512_s21 + $0x41] ss:$0 sm:$0xff] }
  0xda   : > { %v466_v29 = vpop.f32.mrf.mxu0  ;;  %v498_v46 = vpop.f32.mrf.mxu1  ;;  %v597_v54 = vadd.f32 %v2518_v17, %v574_v38  ;;  %v577_v8 = vmul.f32 %v2301_v39, %v2108_v37  ;;  %vm615_vm12 = vcmp.ge.f32.partialorder %v599_v3, 0.0  ;;  %v631_v20 = vmul.f32 0.2, %v599_v3 }
  0xdb   : > { %v592_v31 = vadd.f32 %v2518_v17, %v569_v26  ;;  %v621_v33 = vmul.f32 0.2, %v589_v25  ;;  %v567_v34 = vmul.f32 %v2103_v18, %v466_v29  ;;  %vm605_vm4 = vcmp.ge.f32.partialorder %v589_v25, 0.0 }
  0xdc   : > { %v2296_v35 = vpop.f32.mrf.mxu0  ;;  %v639_v41 = vsel %vm607_vm3, %v591_v21, %v623_v28  ;;  %v2304_v55 = vpop.f32.mrf.mxu1  ;;  %v629_v5 = vmul.f32 0.2, %v597_v54  ;;  %vm613_vm9 = vcmp.ge.f32.partialorder %v597_v54, 0.0  ;;  %v575_v9 = vmul.f32 %v2107_v27, %v498_v46  ;;  %v2110_v28 = vld [vmem:[%s2512_s21 + $0x70] ss:$0 sm:$0xff] }
  0xdd   : > { %vm608_vm5 = vcmp.ge.f32.partialorder %v592_v31, 0.0  ;;  %v624_v40 = vmul.f32 0.2, %v592_v31  ;;  %v590_v43 = vadd.f32 %v2518_v17, %v567_v34  ;;  %v572_v44 = vmul.f32 %v2296_v35, %v2106_v32 }
  0xde   : > { %v479_v45 = vpop.f32.mrf.mxu0  ;;  %v637_v50 = vsel %vm605_vm4, %v589_v25, %v621_v33  ;;  %v695_v56 = vmul.f32 %v2113_v42, %v639_v41  ;;  %v511_v63 = vpop.f32.mrf.mxu1  ;;  %v598_v19 = vadd.f32 %v2518_v17, %v575_v9  ;;  %v645_v21 = vsel %vm613_vm9, %v597_v54, %v629_v5  ;;  %v2413_v9 = vld [vmem:[%s2823_s4 + $0x10] sm:$0xff]  }
  0xdf   : > { %v640_v47 = vsel %vm608_vm5, %v592_v31, %v624_v40  ;;  %v570_v48 = vmul.f32 %v2105_v36, %v479_v45  ;;  %vm606_vm6 = vcmp.ge.f32.partialorder %v590_v43, 0.0  ;;  %v622_v52 = vmul.f32 0.2, %v590_v43 }
  0xe0   : > { %v2297_v53 = vpop.f32.mrf.mxu0  ;;  %v696_v58 = vmul.f32 %v2113_v42, %v640_v47  ;;  %v595_v60 = vadd.f32 %v2518_v17, %v572_v44  ;;  %v693_v0 = vmul.f32 %v2112_v51, %v637_v50  ;;  %v2305_v7 = vpop.f32.mrf.mxu1  ;;  %v578_v23 = vmul.f32 %v2109_v11, %v511_v63 }
  0xe1   : > { %v593_v57 = vadd.f32 %v2518_v17, %v570_v48  ;;  %v638_v59 = vsel %vm606_vm6, %v590_v43, %v622_v52  ;;  %v573_v61 = vmul.f32 %v2297_v53, %v2106_v32  ;;  %v600_v27 = vadd.f32 %v2518_v17, %v577_v8  ;;  %v2115_v32 = vld [vmem:[%s2512_s21 + $0x31] ss:$0 sm:$0xff]  ;;  %v2412_v8 = vld [vmem:[%s2823_s4 + $0x18] sm:$0xff]  }
  0xe2   : > { %v482_v62 = vpop.f32.mrf.mxu0  ;;  %v694_v1 = vmul.f32 %v2112_v51, %v638_v59  ;;  %v710_v12 = vpack.c.bf16 %v696_v58, %v695_v56  ;;  %v627_v13 = vmul.f32 0.2, %v595_v60  ;;  %vm611_vm11 = vcmp.ge.f32.partialorder %v595_v60, 0.0  ;;  %v514_v24 = vpop.f32.mrf.mxu1  ;;  %v2118_v51 = vld [vmem:[%s2512_s21 + $0x61] ss:$0 sm:$0xff]  ;;  %2326 = vmatprep.subr.bf16.mxu0 %v2412_v8 }
  0xe3   : > { %v625_v2 = vmul.f32 0.2, %v593_v57  ;;  %vm609_vm8 = vcmp.ge.f32.partialorder %v593_v57, 0.0  ;;  %v596_v4 = vadd.f32 %v2518_v17, %v573_v61  ;;  %v571_v6 = vmul.f32 %v2105_v36, %v482_v62  ;;  %v2117_v53 = vld [vmem:[%s2512_s21 + $0x51] ss:$0 sm:$0xff]  ;;  %2327 = vmatpush3.bf16.msra.mxu0 %v2412_v8 }
  0xe4   : > { %v709_v10 = vpack.c.bf16 %v694_v1, %v693_v0  ;;  %v643_v29 = vsel %vm611_vm11, %v595_v60, %v627_v13  ;;  %vm614_vm14 = vcmp.ge.f32.partialorder %v598_v19, 0.0  ;;  %v630_v31 = vmul.f32 0.2, %v598_v19  ;;  %2328 = vmatprep.subr.bf16.mxu0 %v2413_v9  ;;  %v2130_v13 = vld [vmem:[%s2512_s21 + $0x4] ss:$0 sm:$0xff] }
  0xe5   : > { %vm612_vm10 = vcmp.ge.f32.partialorder %v596_v4, 0.0  ;;  %v628_v14 = vmul.f32 0.2, %v596_v4  ;;  %v641_v15 = vsel %vm609_vm8, %v593_v57, %v625_v2  ;;  %v594_v18 = vadd.f32 %v2518_v17, %v571_v6  ;;  %v2142_v8 = vld [vmem:[%s2512_s21 + $0x32] ss:$0 sm:$0xff] }
  0xe6   : > { %2310 = vmatprep.mubr.msk.bf16.mxu1 %vm733_vm7, %v709_v10  ;;  %v697_v30 = vmul.f32 %v2114_v16, %v641_v15  ;;  %v701_v33 = vmul.f32 %v2116_v22, %v645_v21  ;;  %v601_v35 = vadd.f32 %v2518_v17, %v578_v23  ;;  %v579_v36 = vmul.f32 %v2109_v11, %v514_v24  ;;  %v2414_v10 = vld [vmem:[%s2823_s4 + $0x28] sm:$0xff]   ;;  %v2131_v11 = vld [vmem:[%s2512_s21 + $0x14] ss:$0 sm:$0xff]  ;;  %v2576_v15 = vld [vmem:[%s2824_s5] ss:$0 sm:$0xff] }
  0xe7   : > { %2311 = vmatmul.mubr.msk.bf16.vlgmr.msra.gmra.mxu1 %vm733_vm7, %v710_v12  ;;  %v644_v25 = vsel %vm612_vm10, %v596_v4, %v628_v14  ;;  %vm610_vm13 = vcmp.ge.f32.partialorder %v594_v18, 0.0  ;;  %v626_v26 = vmul.f32 0.2, %v594_v18  ;;  %v646_v39 = vsel %vm614_vm14, %v598_v19, %v630_v31  ;;  %2329 = vmatpush3.bf16.msra.mxu0 %v2413_v9 }
  0xe8   : > { %v700_v37 = vmul.f32 %v2115_v32, %v644_v25  ;;  %v580_v40 = vmul.f32 %v2304_v55, %v2110_v28  ;;  %v632_v41 = vmul.f32 0.2, %v600_v27  ;;  %v702_v42 = vmul.f32 %v2116_v22, %v646_v39  ;;  %2346 = vmatprep.subr.bf16.mxu1 %v2414_v10 }
  0xe9   : > { %v642_v34 = vsel %vm610_vm13, %v594_v18, %v626_v26  ;;  %vm617_vm15 = vcmp.ge.f32.partialorder %v601_v35, 0.0  ;;  %v581_v43 = vmul.f32 %v2305_v7, %v2110_v28  ;;  %v699_v44 = vmul.f32 %v2115_v32, %v643_v29  ;;  %2347 = vmatpush3.bf16.msra.mxu1 %v2414_v10  ;;  %v2132_v32 = vld [vmem:[%s2512_s21 + $0x24] ss:$0 sm:$0xff] }
  0xea   : > { %v698_v38 = vmul.f32 %v2114_v16, %v642_v34  ;;  %vm616_vm0 = vcmp.ge.f32.partialorder %v600_v27, 0.0  ;;  %v633_v45 = vmul.f32 0.2, %v601_v35  ;;  %v602_v46 = vadd.f32 %v2518_v17, %v579_v36 }
  0xeb   : > { %v713_v48 = vpack.c.bf16 %v702_v42, %v701_v33  ;;  %v647_v49 = vsel %vm615_vm12, %v599_v3, %v631_v20  ;;  %v712_v52 = vpack.c.bf16 %v700_v37, %v699_v44  ;;  %v648_v54 = vsel %vm616_vm0, %v600_v27, %v632_v41  ;;  %v2119_v3 = vld [vmem:[%s2512_s21 + $0x71] ss:$0 sm:$0xff]  ;;  %v2133_v27 = vld [vmem:[%s2512_s21 + $0x34] ss:$0 sm:$0xff] }
  0xec   : > { %v711_v47 = vpack.c.bf16 %v698_v38, %v697_v30  ;;  %v649_v50 = vsel %vm617_vm15, %v601_v35, %v633_v45  ;;  %vm618_vm1 = vcmp.ge.f32.partialorder %v602_v46, 0.0  ;;  %v603_v55 = vadd.f32 %v2518_v17, %v580_v40  ;;  %v2140_v38 = vld [vmem:[%s2512_s21 + $0x12] ss:$0 sm:$0xff]  ;;  %v2139_v40 = vld [vmem:[%s2512_s21 + $0x2] ss:$0 sm:$0xff] }
  0xed   : > { %v604_v56 = vadd.f32 %v2518_v17, %v581_v43  ;;  %v634_v57 = vmul.f32 0.2, %v602_v46  ;;  %v705_v58 = vmul.f32 %v2118_v51, %v649_v50  ;;  %v703_v60 = vmul.f32 %v2117_v53, %v647_v49 }
  0xee   : > { %2314 = vmatprep.mubr.msk.bf16.mxu1 %vm733_vm7, %v711_v47  ;;  %v704_v61 = vmul.f32 %v2117_v53, %v648_v54  ;;  %v635_v63 = vmul.f32 0.2, %v603_v55  ;;  %vm619_vm2 = vcmp.ge.f32.partialorder %v603_v55, 0.0 }
  0xef   : > { %2315 = vmatmul.mubr.msk.bf16.gmra.mxu1 %vm733_vm7, %v712_v52  ;;  %v650_v59 = vsel %vm618_vm1, %v602_v46, %v634_v57  ;;  %v636_v0 = vmul.f32 0.2, %v604_v56  ;;  %vm620_vm3 = vcmp.ge.f32.partialorder %v604_v56, 0.0  ;;  %v2135_v52 = vld [vmem:[%s2512_s21 + $0x54] ss:$0 sm:$0xff] }
  0xf0   : > { %2318 = vmatprep.mubr.msk.bf16.mxu1 %vm733_vm7, %v713_v48  ;;  %v706_v62 = vmul.f32 %v2118_v51, %v650_v59  ;;  %v714_v2 = vpack.c.bf16 %v704_v61, %v703_v60  ;;  %v651_v17 = vsel %vm619_vm2, %v603_v55, %v635_v63 }
  0xf1   : > { %v652_v4 = vsel %vm620_vm3, %v604_v56, %v636_v0  ;;  %v707_v5 = vmul.f32 %v2119_v3, %v651_v17 }
  0xf2   : > { %v715_v1 = vpack.c.bf16 %v706_v62, %v705_v58  ;;  %v708_v6 = vmul.f32 %v2119_v3, %v652_v4  ;;  %v2134_v58 = vld [vmem:[%s2512_s21 + $0x44] ss:$0 sm:$0xff]  ;;  %v2141_v3 = vld [vmem:[%s2512_s21 + $0x22] ss:$0 sm:$0xff] }
  0xf4   : > { %v716_v7 = vpack.c.bf16 %v708_v6, %v707_v5 }
  0xf7   : > { %2319 = vmatmul.mubr.msk.bf16.gmra.mxu1 %vm733_vm7, %v714_v2 }
  0xf8   : > { %2322 = vmatprep.mubr.msk.bf16.mxu1 %vm733_vm7, %v715_v1 }
  0xff   : > { %2323 = vmatmul.mubr.msk.bf16.gmra.mxu1 %vm733_vm7, %v716_v7 }
 0x1a7   : > { %v2312_v12 = vpop.f32.mrf.mxu1 }
 0x1a8   : > { %v897_v14 = vmul.f32 %v2312_v12, %v2131_v11 }
 0x1a9   : > { %v792_v16 = vpop.f32.mrf.mxu1 }
 0x1aa   : > { %v895_v18 = vmul.f32 %v2130_v13, %v792_v16  ;;  %v920_v19 = vadd.f32 %v2576_v15, %v897_v14  ;;  %v2137_v16 = vld [vmem:[%s2512_s21 + $0x74] ss:$0 sm:$0xff] }
 0x1ab   : > { %v2313_v20 = vpop.f32.mrf.mxu1 }
 0x1ac   : > { %v918_v21 = vadd.f32 %v2576_v15, %v895_v18  ;;  %v898_v22 = vmul.f32 %v2313_v20, %v2131_v11  ;;  %v952_v25 = vmul.f32 0.2, %v920_v19  ;;  %vm936_vm5 = vcmp.ge.f32.partialorder %v920_v19, 0.0 }
 0x1ad   : > { %v795_v23 = vpop.f32.mrf.mxu1 }
 0x1ae   : > { %v921_v24 = vadd.f32 %v2576_v15, %v898_v22  ;;  %v896_v26 = vmul.f32 %v2130_v13, %v795_v23  ;;  %v950_v28 = vmul.f32 0.2, %v918_v21  ;;  %vm934_vm6 = vcmp.ge.f32.partialorder %v918_v21, 0.0 }
 0x1af   : > { %v2316_v31 = vpop.f32.mrf.mxu1  ;;  %v968_v37 = vsel %vm936_vm5, %v920_v19, %v952_v25 }
 0x1b0   : > { %vm937_vm4 = vcmp.ge.f32.partialorder %v921_v24, 0.0  ;;  %v953_v29 = vmul.f32 0.2, %v921_v24  ;;  %v919_v30 = vadd.f32 %v2576_v15, %v896_v26  ;;  %v901_v34 = vmul.f32 %v2316_v31, %v2133_v27 }
 0x1b1   : > { %v808_v36 = vpop.f32.mrf.mxu1  ;;  %v966_v39 = vsel %vm934_vm6, %v918_v21, %v950_v28  ;;  %v1024_v48 = vmul.f32 %v2140_v38, %v968_v37 }
 0x1b2   : > { %v969_v33 = vsel %vm937_vm4, %v921_v24, %v953_v29  ;;  %vm935_vm8 = vcmp.ge.f32.partialorder %v919_v30, 0.0  ;;  %v951_v35 = vmul.f32 0.2, %v919_v30  ;;  %v899_v41 = vmul.f32 %v2132_v32, %v808_v36 }
 0x1b3   : > { %v1025_v42 = vmul.f32 %v2140_v38, %v969_v33  ;;  %v2317_v44 = vpop.f32.mrf.mxu1  ;;  %v924_v46 = vadd.f32 %v2576_v15, %v901_v34  ;;  %v1022_v49 = vmul.f32 %v2139_v40, %v966_v39  ;;  %v2143_v34 = vld [vmem:[%s2512_s21 + $0x42] ss:$0 sm:$0xff]  ;;  %v2144_v39 = vld [vmem:[%s2512_s21 + $0x52] ss:$0 sm:$0xff] }
 0x1b4   : > { %v967_v43 = vsel %vm935_vm8, %v919_v30, %v951_v35  ;;  %v922_v47 = vadd.f32 %v2576_v15, %v899_v41  ;;  %v902_v50 = vmul.f32 %v2317_v44, %v2133_v27  ;;  %v2136_v27 = vld [vmem:[%s2512_s21 + $0x64] ss:$0 sm:$0xff] }
 0x1b5   : > { %v1023_v45 = vmul.f32 %v2139_v40, %v967_v43  ;;  %v811_v51 = vpop.f32.mrf.mxu1  ;;  %v1039_v54 = vpack.c.bf16 %v1025_v42, %v1024_v48  ;;  %v956_v60 = vmul.f32 0.2, %v924_v46  ;;  %vm940_vm10 = vcmp.ge.f32.partialorder %v924_v46, 0.0 }
 0x1b6   : > { %v900_v53 = vmul.f32 %v2132_v32, %v811_v51  ;;  %v954_v55 = vmul.f32 0.2, %v922_v47  ;;  %v925_v56 = vadd.f32 %v2576_v15, %v902_v50  ;;  %vm938_vm9 = vcmp.ge.f32.partialorder %v922_v47, 0.0 }
 0x1b7   : > { %v2320_v57 = vpop.f32.mrf.mxu1  ;;  %v1038_v59 = vpack.c.bf16 %v1023_v45, %v1022_v49  ;;  %v972_v7 = vsel %vm940_vm10, %v924_v46, %v956_v60 }
 0x1b8   : > { %v923_v61 = vadd.f32 %v2576_v15, %v900_v53  ;;  %v905_v62 = vmul.f32 %v2320_v57, %v2135_v52  ;;  %vm941_vm11 = vcmp.ge.f32.partialorder %v925_v56, 0.0  ;;  %v957_v63 = vmul.f32 0.2, %v925_v56 }
 0x1b9   : > { %v824_v0 = vpop.f32.mrf.mxu1  ;;  %2330 = vmatprep.mubr.msk.bf16.mxu0 %vm733_vm7, %v1038_v59  ;;  %v970_v17 = vsel %vm938_vm9, %v922_v47, %v954_v55  ;;  %v1028_v20 = vmul.f32 %v2142_v8, %v972_v7  ;;  %v2161_v7 = vld [vmem:[%s2512_s21 + $0x5] ss:$0 sm:$0xff] }
 0x1ba   : > { %vm939_vm12 = vcmp.ge.f32.partialorder %v923_v61, 0.0  ;;  %v955_v1 = vmul.f32 0.2, %v923_v61  ;;  %v903_v2 = vmul.f32 %v2134_v58, %v824_v0  ;;  %2331 = vmatmul.mubr.msk.bf16.vlgmr.msra.gmra.mxu0 %vm733_vm7, %v1039_v54  ;;  %v973_v4 = vsel %vm941_vm11, %v925_v56, %v957_v63 }
 0x1bb   : > { %v928_v5 = vadd.f32 %v2576_v15, %v905_v62  ;;  %v2321_v6 = vpop.f32.mrf.mxu1  ;;  %v1029_v10 = vmul.f32 %v2142_v8, %v973_v4  ;;  %v1026_v18 = vmul.f32 %v2141_v3, %v970_v17  ;;  %v2146_v62 = vld [vmem:[%s2512_s21 + $0x72] ss:$0 sm:$0xff]  ;;  %v2415_v4 = vld [vmem:[%s2823_s4 + $0x20] sm:$0xff]  }
 0x1bc   : > { %v971_v9 = vsel %vm939_vm12, %v923_v61, %v955_v1  ;;  %v926_v12 = vadd.f32 %v2576_v15, %v903_v2  ;;  %v906_v13 = vmul.f32 %v2321_v6, %v2135_v52  ;;  %2348 = vmatprep.subr.bf16.mxu1 %v2415_v4 }
 0x1bd   : > { %v1027_v11 = vmul.f32 %v2141_v3, %v971_v9  ;;  %v827_v14 = vpop.f32.mrf.mxu1  ;;  %v960_v21 = vmul.f32 0.2, %v928_v5  ;;  %vm944_vm14 = vcmp.ge.f32.partialorder %v928_v5, 0.0  ;;  %v1041_v31 = vpack.c.bf16 %v1029_v10, %v1028_v20  ;;  %2349 = vmatpush3.bf16.msra.mxu1 %v2415_v4  ;;  %v2624_v10 = vld [vmem:[%s2824_s5 + $0x1] ss:$0 sm:$0xff] }
 0x1be   : > { %v904_v19 = vmul.f32 %v2134_v58, %v827_v14  ;;  %v958_v22 = vmul.f32 0.2, %v926_v12  ;;  %v929_v23 = vadd.f32 %v2576_v15, %v906_v13  ;;  %vm942_vm13 = vcmp.ge.f32.partialorder %v926_v12, 0.0  ;;  %v2145_v58 = vld [vmem:[%s2512_s21 + $0x62] ss:$0 sm:$0xff] }
 0x1bf   : > { %v2324_v24 = vpop.f32.mrf.mxu1  ;;  %v1040_v28 = vpack.c.bf16 %v1027_v11, %v1026_v18  ;;  %v976_v38 = vsel %vm944_vm14, %v928_v5, %v960_v21  ;;  %v2162_v5 = vld [vmem:[%s2512_s21 + $0x15] ss:$0 sm:$0xff] }
 0x1c0   : > { %v927_v25 = vadd.f32 %v2576_v15, %v904_v19  ;;  %v909_v26 = vmul.f32 %v2324_v24, %v2137_v16  ;;  %vm945_vm15 = vcmp.ge.f32.partialorder %v929_v23, 0.0  ;;  %v961_v29 = vmul.f32 0.2, %v929_v23  ;;  %v2164_v20 = vld [vmem:[%s2512_s21 + $0x35] ss:$0 sm:$0xff] }
 0x1c1   : > { %v840_v30 = vpop.f32.mrf.mxu1  ;;  %2334 = vmatprep.mubr.msk.bf16.mxu0 %vm733_vm7, %v1040_v28  ;;  %v974_v33 = vsel %vm942_vm13, %v926_v12, %v958_v22  ;;  %v1032_v49 = vmul.f32 %v2144_v39, %v976_v38  ;;  %v2163_v28 = vld [vmem:[%s2512_s21 + $0x25] ss:$0 sm:$0xff]  ;;  %v2172_v38 = vld [vmem:[%s2512_s21 + $0x13] ss:$0 sm:$0xff] }
 0x1c2   : > { %vm943_vm0 = vcmp.ge.f32.partialorder %v927_v25, 0.0  ;;  %v959_v32 = vmul.f32 0.2, %v927_v25  ;;  %v977_v35 = vsel %vm945_vm15, %v929_v23, %v961_v29  ;;  %v907_v36 = vmul.f32 %v2136_v27, %v840_v30  ;;  %2335 = vmatmul.mubr.msk.bf16.gmra.mxu0 %vm733_vm7, %v1041_v31 }
 0x1c3   : > { %v2325_v37 = vpop.f32.mrf.mxu1  ;;  %v932_v41 = vadd.f32 %v2576_v15, %v909_v26  ;;  %v1033_v42 = vmul.f32 %v2144_v39, %v977_v35  ;;  %v1030_v47 = vmul.f32 %v2143_v34, %v974_v33  ;;  %v2171_v33 = vld [vmem:[%s2512_s21 + $0x3] ss:$0 sm:$0xff] }
 0x1c4   : > { %v975_v40 = vsel %vm943_vm0, %v927_v25, %v959_v32  ;;  %v930_v44 = vadd.f32 %v2576_v15, %v907_v36  ;;  %v910_v45 = vmul.f32 %v2325_v37, %v2137_v16 }
 0x1c5   : > { %v1031_v43 = vmul.f32 %v2143_v34, %v975_v40  ;;  %v843_v46 = vpop.f32.mrf.mxu1  ;;  %v964_v52 = vmul.f32 0.2, %v932_v41  ;;  %vm948_vm2 = vcmp.ge.f32.partialorder %v932_v41, 0.0  ;;  %v1043_v56 = vpack.c.bf16 %v1033_v42, %v1032_v49 }
 0x1c6   : > { %v908_v48 = vmul.f32 %v2136_v27, %v843_v46  ;;  %vm946_vm1 = vcmp.ge.f32.partialorder %v930_v44, 0.0  ;;  %v962_v50 = vmul.f32 0.2, %v930_v44  ;;  %v933_v51 = vadd.f32 %v2576_v15, %v910_v45  ;;  %v2166_v45 = vld [vmem:[%s2512_s21 + $0x55] ss:$0 sm:$0xff] }
 0x1c7   : > { %v1042_v54 = vpack.c.bf16 %v1031_v43, %v1030_v47  ;;  %v980_v61 = vsel %vm948_vm2, %v932_v41, %v964_v52 }
 0x1c8   : > { %v931_v53 = vadd.f32 %v2576_v15, %v908_v48  ;;  %vm949_vm3 = vcmp.ge.f32.partialorder %v933_v51, 0.0  ;;  %v965_v55 = vmul.f32 0.2, %v933_v51  ;;  %v978_v57 = vsel %vm946_vm1, %v930_v44, %v962_v50 }
 0x1c9   : > { %2338 = vmatprep.mubr.msk.bf16.mxu0 %vm733_vm7, %v1042_v54  ;;  %v1034_v15 = vmul.f32 %v2145_v58, %v978_v57  ;;  %v1036_v2 = vmul.f32 %v2146_v62, %v980_v61 }
 0x1ca   : > { %vm947_vm4 = vcmp.ge.f32.partialorder %v931_v53, 0.0  ;;  %v963_v59 = vmul.f32 0.2, %v931_v53  ;;  %v981_v60 = vsel %vm949_vm3, %v933_v51, %v965_v55  ;;  %2339 = vmatmul.mubr.msk.bf16.gmra.mxu0 %vm733_vm7, %v1043_v56  ;;  %v2165_v55 = vld [vmem:[%s2512_s21 + $0x45] ss:$0 sm:$0xff] }
 0x1cb   : > { %v1037_v0 = vmul.f32 %v2146_v62, %v981_v60  ;;  %v2173_v62 = vld [vmem:[%s2512_s21 + $0x23] ss:$0 sm:$0xff] }
 0x1cc   : > { %v979_v63 = vsel %vm947_vm4, %v931_v53, %v963_v59 }
 0x1cd   : > { %v1035_v1 = vmul.f32 %v2145_v58, %v979_v63  ;;  %v1045_v3 = vpack.c.bf16 %v1037_v0, %v1036_v2 }
 0x1cf   : > { %v1044_v17 = vpack.c.bf16 %v1035_v1, %v1034_v15 }
 0x1d1   : > { %2342 = vmatprep.mubr.msk.bf16.mxu0 %vm733_vm7, %v1044_v17  ;;  %v2174_v17 = vld [vmem:[%s2512_s21 + $0x33] ss:$0 sm:$0xff] }
 0x1d2   : > { %2343 = vmatmul.mubr.msk.bf16.gmra.mxu0 %vm733_vm7, %v1045_v3 }
 0x27a   : > { %v2332_v6 = vpop.f32.mrf.mxu0 }
 0x27b   : > { %v1226_v8 = vmul.f32 %v2332_v6, %v2162_v5 }
 0x27c   : > { %v1121_v9 = vpop.f32.mrf.mxu0 }
 0x27d   : > { %v1224_v11 = vmul.f32 %v2161_v7, %v1121_v9  ;;  %v1250_v16 = vadd.f32 %v2624_v10, %v1226_v8  ;;  %v2168_v9 = vld [vmem:[%s2512_s21 + $0x75] ss:$0 sm:$0xff] }
 0x27e   : > { %v2333_v12 = vpop.f32.mrf.mxu0 }
 0x27f   : > { %v1248_v13 = vadd.f32 %v2624_v10, %v1224_v11  ;;  %v1227_v14 = vmul.f32 %v2333_v12, %v2162_v5  ;;  %v1282_v25 = vmul.f32 0.2, %v1250_v16  ;;  %vm1266_vm8 = vcmp.ge.f32.partialorder %v1250_v16, 0.0 }
 0x280   : > { %v1124_v18 = vpop.f32.mrf.mxu0 }
 0x281   : > { %v1251_v19 = vadd.f32 %v2624_v10, %v1227_v14  ;;  %v1225_v21 = vmul.f32 %v2161_v7, %v1124_v18  ;;  %v1280_v22 = vmul.f32 0.2, %v1248_v13  ;;  %vm1264_vm6 = vcmp.ge.f32.partialorder %v1248_v13, 0.0 }
 0x282   : > { %v2336_v24 = vpop.f32.mrf.mxu0  ;;  %v1298_v37 = vsel %vm1266_vm8, %v1250_v16, %v1282_v25 }
 0x283   : > { %vm1267_vm5 = vcmp.ge.f32.partialorder %v1251_v19, 0.0  ;;  %v1283_v23 = vmul.f32 0.2, %v1251_v19  ;;  %v1249_v26 = vadd.f32 %v2624_v10, %v1225_v21  ;;  %v1230_v27 = vmul.f32 %v2336_v24, %v2164_v20 }
 0x284   : > { %v1137_v29 = vpop.f32.mrf.mxu0  ;;  %v1296_v32 = vsel %vm1264_vm6, %v1248_v13, %v1280_v22  ;;  %v1354_v48 = vmul.f32 %v2172_v38, %v1298_v37  ;;  %v2167_v22 = vld [vmem:[%s2512_s21 + $0x65] ss:$0 sm:$0xff] }
 0x285   : > { %v1299_v30 = vsel %vm1267_vm5, %v1251_v19, %v1283_v23  ;;  %vm1265_vm9 = vcmp.ge.f32.partialorder %v1249_v26, 0.0  ;;  %v1281_v31 = vmul.f32 0.2, %v1249_v26  ;;  %v1254_v34 = vadd.f32 %v2624_v10, %v1230_v27 }
 0x286   : > { %v1228_v35 = vmul.f32 %v2163_v28, %v1137_v29  ;;  %v2337_v36 = vpop.f32.mrf.mxu0  ;;  %v1355_v40 = vmul.f32 %v2172_v38, %v1299_v30  ;;  %v1352_v46 = vmul.f32 %v2171_v33, %v1296_v32  ;;  %v2175_v29 = vld [vmem:[%s2512_s21 + $0x43] ss:$0 sm:$0xff] }
 0x287   : > { %v1297_v39 = vsel %vm1265_vm9, %v1249_v26, %v1281_v31  ;;  %v1231_v43 = vmul.f32 %v2337_v36, %v2164_v20  ;;  %v1286_v49 = vmul.f32 0.2, %v1254_v34  ;;  %vm1270_vm11 = vcmp.ge.f32.partialorder %v1254_v34, 0.0 }
 0x288   : > { %v1353_v41 = vmul.f32 %v2171_v33, %v1297_v39  ;;  %v1252_v42 = vadd.f32 %v2624_v10, %v1228_v35  ;;  %v1140_v44 = vpop.f32.mrf.mxu0  ;;  %v1369_v57 = vpack.c.bf16 %v1355_v40, %v1354_v48 }
 0x289   : > { %v1229_v47 = vmul.f32 %v2163_v28, %v1140_v44  ;;  %v1255_v51 = vadd.f32 %v2624_v10, %v1231_v43  ;;  %v1302_v2 = vsel %vm1270_vm11, %v1254_v34, %v1286_v49  ;;  %v2176_v34 = vld [vmem:[%s2512_s21 + $0x53] ss:$0 sm:$0xff] }
 0x28a   : > { %v1284_v50 = vmul.f32 0.2, %v1252_v42  ;;  %v2340_v52 = vpop.f32.mrf.mxu0  ;;  %vm1268_vm10 = vcmp.ge.f32.partialorder %v1252_v42, 0.0  ;;  %v1368_v56 = vpack.c.bf16 %v1353_v41, %v1352_v46  ;;  %v1358_v13 = vmul.f32 %v2174_v17, %v1302_v2  ;;  %v2419_v2 = vld [vmem:[%s2825_s6] sm:$0xff]  }
 0x28b   : > { %v1253_v53 = vadd.f32 %v2624_v10, %v1229_v47  ;;  %v1234_v54 = vmul.f32 %v2340_v52, %v2166_v45  ;;  %vm1271_vm12 = vcmp.ge.f32.partialorder %v1255_v51, 0.0  ;;  %v1287_v58 = vmul.f32 0.2, %v1255_v51 }
 0x28c   : > { %v1153_v59 = vpop.f32.mrf.mxu0  ;;  %2350 = vmatprep.mubr.msk.bf16.mxu1 %vm733_vm7, %v1368_v56  ;;  %v1300_v61 = vsel %vm1268_vm10, %v1252_v42, %v1284_v50 }
 0x28d   : > { %vm1269_vm13 = vcmp.ge.f32.partialorder %v1253_v53, 0.0  ;;  %v1285_v60 = vmul.f32 0.2, %v1253_v53  ;;  %v1303_v63 = vsel %vm1271_vm12, %v1255_v51, %v1287_v58  ;;  %v1258_v15 = vadd.f32 %v2624_v10, %v1234_v54  ;;  %2351 = vmatmul.mubr.msk.bf16.vlgmr.msra.gmra.mxu1 %vm733_vm7, %v1369_v57  ;;  %v2178_v57 = vld [vmem:[%s2512_s21 + $0x73] ss:$0 sm:$0xff] }
 0x28e   : > { %v1232_v0 = vmul.f32 %v2165_v55, %v1153_v59  ;;  %v2341_v1 = vpop.f32.mrf.mxu0  ;;  %v1359_v4 = vmul.f32 %v2174_v17, %v1303_v63  ;;  %v1356_v11 = vmul.f32 %v2173_v62, %v1300_v61  ;;  %v2194_v17 = vld [vmem:[%s2512_s21 + $0x16] ss:$0 sm:$0xff] }
 0x28f   : > { %v1301_v3 = vsel %vm1269_vm13, %v1253_v53, %v1285_v60  ;;  %v1235_v7 = vmul.f32 %v2341_v1, %v2166_v45  ;;  %v1290_v14 = vmul.f32 0.2, %v1258_v15  ;;  %vm1274_vm15 = vcmp.ge.f32.partialorder %v1258_v15, 0.0  ;;  %v2177_v53 = vld [vmem:[%s2512_s21 + $0x63] ss:$0 sm:$0xff]  ;;  %v2418_v1 = vld [vmem:[%s2825_s6 + $0x8] sm:$0xff]  }
 0x290   : > { %v1357_v5 = vmul.f32 %v2173_v62, %v1301_v3  ;;  %v1256_v6 = vadd.f32 %v2624_v10, %v1232_v0  ;;  %v1156_v8 = vpop.f32.mrf.mxu0  ;;  %v1371_v26 = vpack.c.bf16 %v1359_v4, %v1358_v13  ;;  %v2417_v0 = vld [vmem:[%s2825_s6 + $0x10] sm:$0xff]   ;;  %v2680_v4 = vld [vmem:[%s2824_s5 + $0x2] ss:$0 sm:$0xff] }
 0x291   : > { %v1233_v12 = vmul.f32 %v2165_v55, %v1156_v8  ;;  %v1259_v18 = vadd.f32 %v2624_v10, %v1235_v7  ;;  %v1306_v33 = vsel %vm1274_vm15, %v1258_v15, %v1290_v14  ;;  %v2416_v15 = vld [vmem:[%s2825_s6 + $0x18] sm:$0xff]  }
 0x292   : > { %v1288_v16 = vmul.f32 0.2, %v1256_v6  ;;  %v2344_v19 = vpop.f32.mrf.mxu0  ;;  %vm1272_vm14 = vcmp.ge.f32.partialorder %v1256_v6, 0.0  ;;  %v1370_v23 = vpack.c.bf16 %v1357_v5, %v1356_v11  ;;  %v1362_v44 = vmul.f32 %v2176_v34, %v1306_v33  ;;  %2366 = vmatprep.subr.bf16.mxu0 %v2416_v15  ;;  %v2193_v5 = vld [vmem:[%s2512_s21 + $0x6] ss:$0 sm:$0xff] }
 0x293   : > { %v1257_v20 = vadd.f32 %v2624_v10, %v1233_v12  ;;  %v1238_v21 = vmul.f32 %v2344_v19, %v2168_v9  ;;  %vm1275_vm0 = vcmp.ge.f32.partialorder %v1259_v18, 0.0  ;;  %v1291_v24 = vmul.f32 0.2, %v1259_v18  ;;  %2367 = vmatpush3.bf16.msra.mxu0 %v2416_v15 }
 0x294   : > { %v1169_v25 = vpop.f32.mrf.mxu0  ;;  %2354 = vmatprep.mubr.msk.bf16.mxu1 %vm733_vm7, %v1370_v23  ;;  %v1304_v28 = vsel %vm1272_vm14, %v1256_v6, %v1288_v16  ;;  %2368 = vmatprep.subr.bf16.mxu0 %v2417_v0  ;;  %v2195_v23 = vld [vmem:[%s2512_s21 + $0x26] ss:$0 sm:$0xff] }
 0x295   : > { %vm1273_vm1 = vcmp.ge.f32.partialorder %v1257_v20, 0.0  ;;  %v1289_v27 = vmul.f32 0.2, %v1257_v20  ;;  %v1307_v30 = vsel %vm1275_vm0, %v1259_v18, %v1291_v24  ;;  %v1236_v31 = vmul.f32 %v2167_v22, %v1169_v25  ;;  %2355 = vmatmul.mubr.msk.bf16.gmra.mxu1 %vm733_vm7, %v1371_v26  ;;  %v2196_v18 = vld [vmem:[%s2512_s21 + $0x36] ss:$0 sm:$0xff] }
 0x296   : > { %v2345_v32 = vpop.f32.mrf.mxu0  ;;  %v1262_v36 = vadd.f32 %v2624_v10, %v1238_v21  ;;  %v1363_v37 = vmul.f32 %v2176_v34, %v1307_v30  ;;  %v1360_v42 = vmul.f32 %v2175_v29, %v1304_v28  ;;  %v2204_v28 = vld [vmem:[%s2512_s21 + $0x17] ss:$0 sm:$0xff] }
 0x297   : > { %v1305_v35 = vsel %vm1273_vm1, %v1257_v20, %v1289_v27  ;;  %v1260_v39 = vadd.f32 %v2624_v10, %v1236_v31  ;;  %v1239_v40 = vmul.f32 %v2345_v32, %v2168_v9  ;;  %2369 = vmatpush3.bf16.msra.mxu0 %v2417_v0  ;;  %v2212_v31 = vld [vmem:[%s2512_s21 + $0x18] ss:$0 sm:$0xff] }
 0x298   : > { %v1361_v38 = vmul.f32 %v2175_v29, %v1305_v35  ;;  %v1172_v41 = vpop.f32.mrf.mxu0  ;;  %v1294_v47 = vmul.f32 0.2, %v1262_v36  ;;  %vm1278_vm3 = vcmp.ge.f32.partialorder %v1262_v36, 0.0  ;;  %v1373_v51 = vpack.c.bf16 %v1363_v37, %v1362_v44  ;;  %2370 = vmatprep.subr.bf16.mxu0 %v2418_v1  ;;  %v2203_v35 = vld [vmem:[%s2512_s21 + $0x7] ss:$0 sm:$0xff] }
 0x299   : > { %v1237_v43 = vmul.f32 %v2167_v22, %v1172_v41  ;;  %vm1276_vm2 = vcmp.ge.f32.partialorder %v1260_v39, 0.0  ;;  %v1292_v45 = vmul.f32 0.2, %v1260_v39  ;;  %v1263_v46 = vadd.f32 %v2624_v10, %v1239_v40  ;;  %v2198_v44 = vld [vmem:[%s2512_s21 + $0x56] ss:$0 sm:$0xff] }
 0x29a   : > { %v1372_v49 = vpack.c.bf16 %v1361_v38, %v1360_v42  ;;  %v1310_v56 = vsel %vm1278_vm3, %v1262_v36, %v1294_v47  ;;  %v2211_v42 = vld [vmem:[%s2512_s21 + $0x8] ss:$0 sm:$0xff] }
 0x29b   : > { %v1261_v48 = vadd.f32 %v2624_v10, %v1237_v43  ;;  %vm1279_vm4 = vcmp.ge.f32.partialorder %v1263_v46, 0.0  ;;  %v1295_v50 = vmul.f32 0.2, %v1263_v46  ;;  %v1308_v52 = vsel %vm1276_vm2, %v1260_v39, %v1292_v45  ;;  %2371 = vmatpush3.bf16.msra.mxu0 %v2418_v1 }
 0x29c   : > { %2358 = vmatprep.mubr.msk.bf16.mxu1 %vm733_vm7, %v1372_v49  ;;  %v1364_v59 = vmul.f32 %v2177_v53, %v1308_v52  ;;  %v1366_v61 = vmul.f32 %v2178_v57, %v1310_v56  ;;  %2372 = vmatprep.subr.bf16.mxu0 %v2419_v2  ;;  %v2197_v56 = vld [vmem:[%s2512_s21 + $0x46] ss:$0 sm:$0xff] }
 0x29d   : > { %vm1277_vm5 = vcmp.ge.f32.partialorder %v1261_v48, 0.0  ;;  %v1293_v54 = vmul.f32 0.2, %v1261_v48  ;;  %v1311_v55 = vsel %vm1279_vm4, %v1263_v46, %v1295_v50  ;;  %2359 = vmatmul.mubr.msk.bf16.gmra.mxu1 %vm733_vm7, %v1373_v51 }
 0x29e   : > { %v1367_v60 = vmul.f32 %v2178_v57, %v1311_v55 }
 0x29f   : > { %v1309_v58 = vsel %vm1277_vm5, %v1261_v48, %v1293_v54  ;;  %2373 = vmatpush3.bf16.msra.mxu0 %v2419_v2 }
 0x2a0   : > { %v1365_v10 = vmul.f32 %v2177_v53, %v1309_v58  ;;  %v1375_v63 = vpack.c.bf16 %v1367_v60, %v1366_v61  ;;  %v2206_v58 = vld [vmem:[%s2512_s21 + $0x37] ss:$0 sm:$0xff]  ;;  %v2214_v61 = vld [vmem:[%s2512_s21 + $0x38] ss:$0 sm:$0xff] }
 0x2a2   : > { %v1374_v62 = vpack.c.bf16 %v1365_v10, %v1364_v59 }
 0x2a4   : > { %2362 = vmatprep.mubr.msk.bf16.mxu1 %vm733_vm7, %v1374_v62 }
 0x2a5   : > { %2363 = vmatmul.mubr.msk.bf16.gmra.mxu1 %vm733_vm7, %v1375_v63 }
 0x34d   : > { %v2352_v3 = vpop.f32.mrf.mxu1 }
 0x34e   : > { %v1556_v6 = vmul.f32 %v2352_v3, %v2194_v17 }
 0x34f   : > { %v1451_v7 = vpop.f32.mrf.mxu1 }
 0x350   : > { %v1580_v8 = vadd.f32 %v2680_v4, %v1556_v6  ;;  %v1554_v9 = vmul.f32 %v2193_v5, %v1451_v7  ;;  %v2213_v7 = vld [vmem:[%s2512_s21 + $0x28] ss:$0 sm:$0xff] }
 0x351   : > { %v2353_v11 = vpop.f32.mrf.mxu1 }
 0x352   : > { %vm1596_vm6 = vcmp.ge.f32.partialorder %v1580_v8, 0.0  ;;  %v1612_v12 = vmul.f32 0.2, %v1580_v8  ;;  %v1578_v13 = vadd.f32 %v2680_v4, %v1554_v9  ;;  %v1557_v14 = vmul.f32 %v2353_v11, %v2194_v17 }
 0x353   : > { %v1454_v16 = vpop.f32.mrf.mxu1 }
 0x354   : > { %v1610_v19 = vmul.f32 0.2, %v1578_v13  ;;  %v1581_v20 = vadd.f32 %v2680_v4, %v1557_v14  ;;  %v1555_v21 = vmul.f32 %v2193_v5, %v1454_v16  ;;  %vm1594_vm8 = vcmp.ge.f32.partialorder %v1578_v13, 0.0  ;;  %v2205_v5 = vld [vmem:[%s2512_s21 + $0x27] ss:$0 sm:$0xff] }
 0x355   : > { %v2356_v22 = vpop.f32.mrf.mxu1  ;;  %v1628_v24 = vsel %vm1596_vm6, %v1580_v8, %v1612_v12 }
 0x356   : > { %vm1597_vm9 = vcmp.ge.f32.partialorder %v1581_v20, 0.0  ;;  %v1613_v25 = vmul.f32 0.2, %v1581_v20  ;;  %v1579_v26 = vadd.f32 %v2680_v4, %v1555_v21  ;;  %v1560_v27 = vmul.f32 %v2356_v22, %v2196_v18 }
 0x357   : > { %v1467_v29 = vpop.f32.mrf.mxu1  ;;  %v1626_v30 = vsel %vm1594_vm8, %v1578_v13, %v1610_v19  ;;  %v2693_v38 = vmul.f32 %v2204_v28, %v1628_v24  ;;  %v1748_v47 = vmul.f32 %v2212_v31, %v1628_v24  ;;  %v2200_v19 = vld [vmem:[%s2512_s21 + $0x76] ss:$0 sm:$0xff]  ;;  %vm1850_vm8 = vcmask 523264  }
 0x358   : > { %v1611_v32 = vmul.f32 0.2, %v1579_v26  ;;  %v1584_v33 = vadd.f32 %v2680_v4, %v1560_v27  ;;  %v1558_v34 = vmul.f32 %v2195_v23, %v1467_v29  ;;  %vm1595_vm10 = vcmp.ge.f32.partialorder %v1579_v26, 0.0  ;;  %v2208_v27 = vld [vmem:[%s2512_s21 + $0x57] ss:$0 sm:$0xff] }
 0x359   : > { %v2357_v36 = vpop.f32.mrf.mxu1  ;;  %v1629_v37 = vsel %vm1597_vm9, %v1581_v20, %v1613_v25  ;;  %v2698_v46 = vmul.f32 %v2203_v35, %v1626_v30  ;;  %v1746_v54 = vmul.f32 %v2211_v42, %v1626_v30 }
 0x35a   : > { %vm1600_vm11 = vcmp.ge.f32.partialorder %v1584_v33, 0.0  ;;  %v1616_v39 = vmul.f32 0.2, %v1584_v33  ;;  %v1582_v40 = vadd.f32 %v2680_v4, %v1558_v34  ;;  %v1561_v41 = vmul.f32 %v2357_v36, %v2196_v18 }
 0x35b   : > { %v1470_v43 = vpop.f32.mrf.mxu1  ;;  %v1627_v45 = vsel %vm1595_vm10, %v1579_v26, %v1611_v32  ;;  %v1749_v48 = vmul.f32 %v2212_v31, %v1629_v37  ;;  %v2708_v15 = vmul.f32 %v2204_v28, %v1629_v37  ;;  %v2199_v32 = vld [vmem:[%s2512_s21 + $0x66] ss:$0 sm:$0xff]  ;;  %v2216_v37 = vld [vmem:[%s2512_s21 + $0x58] ss:$0 sm:$0xff] }
 0x35c   : > { %v1614_v49 = vmul.f32 0.2, %v1582_v40  ;;  %v1585_v50 = vadd.f32 %v2680_v4, %v1561_v41  ;;  %v1559_v51 = vmul.f32 %v2195_v23, %v1470_v43  ;;  %v1747_v52 = vmul.f32 %v2211_v42, %v1627_v45 }
 0x35d   : > { %v2360_v53 = vpop.f32.mrf.mxu1  ;;  %v2701_v55 = vmul.f32 %v2203_v35, %v1627_v45  ;;  %vm1598_vm12 = vcmp.ge.f32.partialorder %v1582_v40, 0.0  ;;  %v1632_v57 = vsel %vm1600_vm11, %v1584_v33, %v1616_v39  ;;  %v1763_v0 = vpack.c.bf16 %v1749_v48, %v1748_v47 }
 0x35e   : > { %vm1601_vm13 = vcmp.ge.f32.partialorder %v1585_v50, 0.0  ;;  %v1617_v59 = vmul.f32 0.2, %v1585_v50  ;;  %v1583_v60 = vadd.f32 %v2680_v4, %v1559_v51  ;;  %v1564_v10 = vmul.f32 %v2360_v53, %v2198_v44 }
 0x35f   : > { %v1762_v62 = vpack.c.bf16 %v1747_v52, %v1746_v54  ;;  %v1483_v63 = vpop.f32.mrf.mxu1  ;;  %v1630_v1 = vsel %vm1598_vm12, %v1582_v40, %v1614_v49  ;;  %v2715_v9 = vmul.f32 %v2206_v58, %v1632_v57  ;;  %v1752_v11 = vmul.f32 %v2214_v61, %v1632_v57  ;;  %v2207_v52 = vld [vmem:[%s2512_s21 + $0x47] ss:$0 sm:$0xff] }
 0x360   : > { %v1615_v2 = vmul.f32 0.2, %v1583_v60  ;;  %v1588_v17 = vadd.f32 %v2680_v4, %v1564_v10  ;;  %v1562_v3 = vmul.f32 %v2197_v56, %v1483_v63  ;;  %vm1599_vm14 = vcmp.ge.f32.partialorder %v1583_v60, 0.0 }
 0x361   : > { %1778 = vrot.lane.b32.xlu0 %v1762_v62, %s2429_s29  ;;  %v2361_v6 = vpop.f32.mrf.mxu1  ;;  %v1633_v8 = vsel %vm1601_vm13, %v1585_v50, %v1617_v59  ;;  %v1698_v12 = vpack.c.bf16 %v2701_v55, %v2698_v46  ;;  %v2722_v21 = vmul.f32 %v2205_v5, %v1630_v1  ;;  %v1699_v23 = vpack.c.bf16 %v2708_v15, %v2693_v38 }
 0x362   : > { %vm1604_vm15 = vcmp.ge.f32.partialorder %v1588_v17, 0.0  ;;  %v1620_v13 = vmul.f32 0.2, %v1588_v17  ;;  %v1586_v14 = vadd.f32 %v2680_v4, %v1562_v3  ;;  %v1565_v16 = vmul.f32 %v2361_v6, %v2198_v44  ;;  %v2210_v6 = vld [vmem:[%s2512_s21 + $0x77] ss:$0 sm:$0xff] }
 0x363   : > { %v1486_v18 = vpop.f32.mrf.mxu1  ;;  %v1631_v20 = vsel %vm1599_vm14, %v1583_v60, %v1615_v2  ;;  %v1753_v22 = vmul.f32 %v2214_v61, %v1633_v8  ;;  %v1750_v26 = vmul.f32 %v2213_v7, %v1630_v1  ;;  %v2735_v41 = vmul.f32 %v2206_v58, %v1633_v8  ;;  %v2215_v58 = vld [vmem:[%s2512_s21 + $0x48] ss:$0 sm:$0xff] }
 0x364   : > { %vm1602_vm0 = vcmp.ge.f32.partialorder %v1586_v14, 0.0  ;;  %v1589_v24 = vadd.f32 %v2680_v4, %v1565_v16  ;;  %v1563_v25 = vmul.f32 %v2197_v56, %v1486_v18  ;;  %v1618_v28 = vmul.f32 0.2, %v1586_v14  ;;  %v2209_v18 = vld [vmem:[%s2512_s21 + $0x67] ss:$0 sm:$0xff] }
 0x365   : > { %1780 = vrot.lane.b32.xlu0 %v1763_v0, %s2429_s29  ;;  %v2364_v29 = vpop.f32.mrf.mxu1  ;;  %v1751_v30 = vmul.f32 %v2213_v7, %v1631_v20  ;;  %v2729_v31 = vmul.f32 %v2205_v5, %v1631_v20  ;;  %v1636_v33 = vsel %vm1604_vm15, %v1588_v17, %v1620_v13  ;;  %v1765_v42 = vpack.c.bf16 %v1753_v22, %v1752_v11  ;;  %v2218_v11 = vld [vmem:[%s2512_s21 + $0x78] ss:$0 sm:$0xff] }
 0x366   : > { %vm1605_vm1 = vcmp.ge.f32.partialorder %v1589_v24, 0.0  ;;  %v1621_v34 = vmul.f32 0.2, %v1589_v24  ;;  %v1587_v35 = vadd.f32 %v2680_v4, %v1563_v25  ;;  %v1568_v36 = vmul.f32 %v2364_v29, %v2200_v19 }
 0x367   : > { %v1764_v39 = vpack.c.bf16 %v1751_v30, %v1750_v26  ;;  %v1499_v40 = vpop.f32.mrf.mxu1  ;;  %v2737_v43 = vmul.f32 %v2208_v27, %v1636_v33  ;;  %v1756_v50 = vmul.f32 %v2216_v37, %v1636_v33  ;;  %v1634_v51 = vsel %vm1602_vm0, %v1586_v14, %v1618_v28 }
 0x368   : > { %vm1603_vm2 = vcmp.ge.f32.partialorder %v1587_v35, 0.0  ;;  %v1619_v44 = vmul.f32 0.2, %v1587_v35  ;;  %v1592_v45 = vadd.f32 %v2680_v4, %v1568_v36  ;;  %v1566_v47 = vmul.f32 %v2199_v32, %v1499_v40 }
 0x369   : > { %1782 = vrot.lane.b32.xlu1 %v1764_v39, %s2429_s29  ;;  %v2365_v48 = vpop.f32.mrf.mxu1  ;;  %v1637_v49 = vsel %vm1605_vm1, %v1589_v24, %v1621_v34  ;;  %v1700_v53 = vpack.c.bf16 %v2729_v31, %v2722_v21  ;;  %v1701_v62 = vpack.c.bf16 %v2735_v41, %v2715_v9  ;;  %v1690_v2 = vmul.f32 %v2207_v52, %v1634_v51 }
 0x36a   : > { %vm1608_vm3 = vcmp.ge.f32.partialorder %v1592_v45, 0.0  ;;  %v1624_v54 = vmul.f32 0.2, %v1592_v45  ;;  %v1590_v56 = vadd.f32 %v2680_v4, %v1566_v47  ;;  %v1569_v57 = vmul.f32 %v2365_v48, %v2200_v19  ;;  %v2217_v19 = vld [vmem:[%s2512_s21 + $0x68] ss:$0 sm:$0xff] }
 0x36b   : > { %v1502_v59 = vpop.f32.mrf.mxu1  ;;  %v1757_v60 = vmul.f32 %v2216_v37, %v1637_v49  ;;  %v2748_v10 = vmul.f32 %v2208_v27, %v1637_v49  ;;  %v1635_v61 = vsel %vm1603_vm2, %v1587_v35, %v1619_v44  ;;  %v1754_v17 = vmul.f32 %v2215_v58, %v1634_v51  ;;  %v2231_v49 = vld [vmem:[%s2826_s7] ss:$0 sm:$0xff] }
 0x36c   : > { %vm1606_vm4 = vcmp.ge.f32.partialorder %v1590_v56, 0.0  ;;  %v1622_v63 = vmul.f32 0.2, %v1590_v56  ;;  %v1593_v0 = vadd.f32 %v2680_v4, %v1569_v57  ;;  %v1567_v1 = vmul.f32 %v2199_v32, %v1502_v59 }
 0x36d   : > { %1784 = vrot.lane.b32.xlu1 %v1765_v42, %s2429_s29  ;;  %v1755_v3 = vmul.f32 %v2215_v58, %v1635_v61  ;;  %v1640_v5 = vsel %vm1608_vm3, %v1592_v45, %v1624_v54  ;;  %v1691_v9 = vmul.f32 %v2207_v52, %v1635_v61  ;;  %v1767_v13 = vpack.c.bf16 %v1757_v60, %v1756_v50 }
 0x36e   : > { %vm1609_vm5 = vcmp.ge.f32.partialorder %v1593_v0, 0.0  ;;  %v1625_v7 = vmul.f32 0.2, %v1593_v0  ;;  %v1591_v8 = vadd.f32 %v2680_v4, %v1567_v1  ;;  %v1638_v16 = vsel %vm1606_vm4, %v1590_v56, %v1622_v63 }
 0x36f   : > { %v1766_v14 = vpack.c.bf16 %v1755_v3, %v1754_v17  ;;  %v1703_v20 = vpack.c.bf16 %v2748_v10, %v2737_v43  ;;  %v1696_v24 = vmul.f32 %v2210_v6, %v1640_v5  ;;  %v1760_v4 = vmul.f32 %v2218_v11, %v1640_v5 }
 0x370   : > { %vm1607_vm6 = vcmp.ge.f32.partialorder %v1591_v8, 0.0  ;;  %v1623_v21 = vmul.f32 0.2, %v1591_v8  ;;  %v1641_v22 = vsel %vm1609_vm5, %v1593_v0, %v1625_v7  ;;  %v1694_v28 = vmul.f32 %v2209_v18, %v1638_v16 }
 0x371   : > { %1788 = vrot.lane.b32.xlu1 %v1767_v13, %s2429_s29  ;;  %1786 = vrot.lane.b32.xlu0 %v1766_v14, %s2429_s29  ;;  %v1761_v25 = vmul.f32 %v2218_v11, %v1641_v22  ;;  %v1697_v26 = vmul.f32 %v2210_v6, %v1641_v22  ;;  %v1758_v29 = vmul.f32 %v2217_v19, %v1638_v16 }
 0x372   : > { %v1639_v27 = vsel %vm1607_vm6, %v1591_v8, %v1623_v21  ;;  %v1702_v30 = vpack.c.bf16 %v1691_v9, %v1690_v2 }
 0x373   : > { %v1769_v31 = vpack.c.bf16 %v1761_v25, %v1760_v4  ;;  %v1759_v32 = vmul.f32 %v2217_v19, %v1639_v27  ;;  %v1695_v33 = vmul.f32 %v2209_v18, %v1639_v27  ;;  %v1705_v34 = vpack.c.bf16 %v1697_v26, %v1696_v24 }
 0x375   : > { %1792 = vrot.lane.b32.xlu1 %v1769_v31, %s2429_s29  ;;  %v1768_v35 = vpack.c.bf16 %v1759_v32, %v1758_v29  ;;  %v1704_v36 = vpack.c.bf16 %v1695_v33, %v1694_v28 }
 0x377   : > { %1790 = vrot.lane.b32.xlu0 %v1768_v35, %s2429_s29 }
 0x3d3   : > { %v1779_v37 = vpop.permute.xlu0 %1778 }
 0x3d4   : > { %v1796_v39 = vsel %vm733_vm7, %v1698_v12, %v1779_v37 }
 0x3d5   : > { %2374 = vmatprep.mubr.msk.bf16.mxu0 %vm1850_vm8, %v1796_v39 }
 0x3d7   : > { %v1781_v40 = vpop.permute.xlu0 %1780 }
 0x3d8   : > { %v1799_v41 = vsel %vm733_vm7, %v1699_v23, %v1781_v40 }
 0x3d9   : > { %2375 = vmatmul.mubr.msk.bf16.vlgmr.msra.gmra.mxu0 %vm1850_vm8, %v1799_v41 }
 0x3db   : > { %v1783_v42 = vpop.permute.xlu1 %1782 }
 0x3dc   : > { %v1802_v43 = vsel %vm733_vm7, %v1700_v53, %v1783_v42 }
 0x3dd   : > { %2378 = vmatprep.mubr.msk.bf16.mxu0 %vm1850_vm8, %v1802_v43 }
 0x3df   : > { %v1785_v44 = vpop.permute.xlu1 %1784 }
 0x3e0   : > { %v1805_v46 = vsel %vm733_vm7, %v1701_v62, %v1785_v44 }
 0x3e1   : > { %2379 = vmatmul.mubr.msk.bf16.gmra.mxu0 %vm1850_vm8, %v1805_v46 }
 0x3e3   : > { %v1787_v55 = vpop.permute.xlu0 %1786  ;;  %v1789_v45 = vpop.permute.xlu1 %1788 }
 0x3e4   : > { %v1808_v12 = vsel %vm733_vm7, %v1702_v30, %v1787_v55  ;;  %v1811_v38 = vsel %vm733_vm7, %v1703_v20, %v1789_v45 }
 0x3e5   : > { %2382 = vmatprep.mubr.msk.bf16.mxu0 %vm1850_vm8, %v1808_v12 }
 0x3e7   : > { %v1793_v47 = vpop.permute.xlu1 %1792 }
 0x3e8   : > { %v1817_v48 = vsel %vm733_vm7, %v1705_v34, %v1793_v47 }
 0x3e9   : > { %2383 = vmatmul.mubr.msk.bf16.gmra.mxu0 %vm1850_vm8, %v1811_v38  ;;  %v1791_v15 = vpop.permute.xlu0 %1790 }
 0x3ea   : > { %v1814_v23 = vsel %vm733_vm7, %v1704_v36, %v1791_v15 }
 0x3eb   : > { %2386 = vmatprep.mubr.msk.bf16.mxu0 %vm1850_vm8, %v1814_v23 }
 0x3f1   : > { %2387 = vmatmul.mubr.msk.bf16.gmra.mxu0 %vm1850_vm8, %v1817_v48 }
 0x499   : > { %v2376_v50 = vpop.f32.mrf.mxu0 }
 0x49a   : > { %v1973_v51 = vadd.f32 %v2376_v50, %v2231_v49 }
 0x49b   : > { %v1901_v52 = vpop.f32.mrf.mxu0 }
 0x49c   : > { %1989 = vst [vmem:[%s2798_s12 + $0x10] sm:$0xff] %v1973_v51  ;;  %v1971_v53 = vadd.f32 %v2231_v49, %v1901_v52 }
 0x49d   : > { %v2377_v54 = vpop.f32.mrf.mxu0 }
 0x49e   : > { %1987 = vst [vmem:[%s2798_s12] sm:$0xff] %v1971_v53  ;;  %v1974_v56 = vadd.f32 %v2377_v54, %v2231_v49 }
 0x49f   : > { %v1904_v57 = vpop.f32.mrf.mxu0 }
 0x4a0   : > { %1990 = vst [vmem:[%s2798_s12 + $0x18] sm:$0xff] %v1974_v56  ;;  %v1972_v58 = vadd.f32 %v2231_v49, %v1904_v57 }
 0x4a1   : > { %v2380_v59 = vpop.f32.mrf.mxu0 }
 0x4a2   : > { %1988 = vst [vmem:[%s2798_s12 + $0x8] sm:$0xff] %v1972_v58  ;;  %v1977_v60 = vadd.f32 %v2380_v59, %v2231_v49 }
 0x4a3   : > { %v1917_v10 = vpop.f32.mrf.mxu0 }
 0x4a4   : > { %1993 = vst [vmem:[%s2798_s12 + $0x30] sm:$0xff] %v1977_v60  ;;  %v1975_v61 = vadd.f32 %v2231_v49, %v1917_v10 }
 0x4a5   : > { %v2381_v62 = vpop.f32.mrf.mxu0 }
 0x4a6   : > { %1991 = vst [vmem:[%s2798_s12 + $0x20] sm:$0xff] %v1975_v61  ;;  %v1978_v63 = vadd.f32 %v2381_v62, %v2231_v49 }
 0x4a7   : > { %v1920_v0 = vpop.f32.mrf.mxu0 }
 0x4a8   : > { %1994 = vst [vmem:[%s2798_s12 + $0x38] sm:$0xff] %v1978_v63  ;;  %v1976_v1 = vadd.f32 %v2231_v49, %v1920_v0 }
 0x4a9   : > { %v2384_v2 = vpop.f32.mrf.mxu0 }
 0x4aa   : > { %1992 = vst [vmem:[%s2798_s12 + $0x28] sm:$0xff] %v1976_v1  ;;  %v1981_v17 = vadd.f32 %v2384_v2, %v2231_v49 }
 0x4ab   : > { %v1933_v3 = vpop.f32.mrf.mxu0 }
 0x4ac   : > { %1997 = vst [vmem:[%s2798_s12 + $0x50] sm:$0xff] %v1981_v17  ;;  %v1979_v5 = vadd.f32 %v2231_v49, %v1933_v3 }
 0x4ad   : > { %v2385_v6 = vpop.f32.mrf.mxu0 }
 0x4ae   : > { %1995 = vst [vmem:[%s2798_s12 + $0x40] sm:$0xff] %v1979_v5  ;;  %v1982_v7 = vadd.f32 %v2385_v6, %v2231_v49 }
 0x4af   : > { %v1936_v8 = vpop.f32.mrf.mxu0 }
 0x4b0   : > { %1998 = vst [vmem:[%s2798_s12 + $0x58] sm:$0xff] %v1982_v7  ;;  %v1980_v9 = vadd.f32 %v2231_v49, %v1936_v8 }
 0x4b1   : > { %v2388_v11 = vpop.f32.mrf.mxu0 }
 0x4b2   : > { %1996 = vst [vmem:[%s2798_s12 + $0x48] sm:$0xff] %v1980_v9  ;;  %v1985_v13 = vadd.f32 %v2388_v11, %v2231_v49 }
 0x4b3   : > { %v1949_v14 = vpop.f32.mrf.mxu0 }
 0x4b4   : > { %2001 = vst [vmem:[%s2798_s12 + $0x70] sm:$0xff] %v1985_v13  ;;  %v1983_v16 = vadd.f32 %v2231_v49, %v1949_v14 }
 0x4b5   : > { %v2389_v18 = vpop.f32.mrf.mxu0 }
 0x4b6   : > { %1999 = vst [vmem:[%s2798_s12 + $0x60] sm:$0xff] %v1983_v16  ;;  %v1986_v19 = vadd.f32 %v2389_v18, %v2231_v49 }
 0x4b7   : > { %v1952_v20 = vpop.f32.mrf.mxu0 }
 0x4b8   : > { %2002 = vst [vmem:[%s2798_s12 + $0x78] sm:$0xff] %v1986_v19  ;;  %v1984_v21 = vadd.f32 %v2231_v49, %v1952_v20 }
 0x4ba   : > { %2000 = vst [vmem:[%s2798_s12 + $0x68] sm:$0xff] %v1984_v21 }
 0x4bb PF: > { %s18_s27 = sadd.s32 1, %s2426_s27  }
 0x4bc   : > { %p15_p4 = scmp.ge.s32.totalorder %s18_s27, 4  }
 0x4be   :  { %17 = sbr.rel (!%p15_p4) target bundleno = 1 (0x1), region = 89 }

</bundles_post_ra>
